<compile_context>
chip_gen: v6e
topology: v6e:2x2x1
jax: 0.10.0
libtpu: 0.0.40
codegen_flags: <defaults>
</compile_context>

<pallas_src>
import functools

import jax
import jax.numpy as jnp
from jax.experimental import pallas as pl
from jax.experimental.pallas import tpu as pltpu

PI_HALF = 3.14159 / 2          # the PyTorch module clamps with the literal 3.14159/2
BN_EPS = 1e-5
RAW_PARAMS_PER_BLOCK = 12      # w1,b1,g1,be1,m1,v1,w2,b2,g2,be2,m2,v2
PACKED_PARAMS_PER_BLOCK = 5    # w1_h, w1_x, b1, w2, b2  (BN folded into linears)
LANE = 128


# --------------------------------------------------------------------------- #
# Kernel
# --------------------------------------------------------------------------- #
def rotater_kernel(x_ref, *refs, num_blocks, is_euler, compute_dtype):
    """refs = [wpre, bpre, <5 per block>..., wout, bout, o_ref]."""
    o_ref = refs[-1]
    wpre_ref, bpre_ref = refs[0], refs[1]
    wout_ref, bout_ref = refs[-3], refs[-2]
    block_refs = refs[2:2 + PACKED_PARAMS_PER_BLOCK * num_blocks]

    x = x_ref[...]                                              # (TB, K_pad) bf16
    # pre: Linear(K_pad -> C), f32 accumulation on the MXU
    h = jnp.dot(x, wpre_ref[...], preferred_element_type=jnp.float32) + bpre_ref[...]

    # num_blocks is small (1-2); a fully-unrolled Python loop is fine here.
    for blk in range(num_blocks):
        w1h_ref, w1x_ref, b1_ref, w2_ref, b2_ref = block_refs[
            blk * PACKED_PARAMS_PER_BLOCK:(blk + 1) * PACKED_PARAMS_PER_BLOCK]

        # cat([h, x], -1) @ W1  ==  h @ W1_h + x @ W1_x  (split done on the host)
        t = (jnp.dot(h.astype(compute_dtype), w1h_ref[...],
                     preferred_element_type=jnp.float32)
             + jnp.dot(x, w1x_ref[...], preferred_element_type=jnp.float32)
             + b1_ref[...])
        t = jnp.maximum(t, 0.0)                                 # BN folded; Dropout = id (eval)

        t = jnp.dot(t.astype(compute_dtype), w2_ref[...],
                    preferred_element_type=jnp.float32) + b2_ref[...]
        t = jnp.maximum(t, 0.0)

        h = h + t                                               # residual

    # lane-padded output projection: (TB, C) @ (C, 128) -> dense (TB, 128) store
    o = jnp.dot(h.astype(compute_dtype), wout_ref[...],
                preferred_element_type=jnp.float32) + bout_ref[...]
    lim = PI_HALF if is_euler else 1.0
    o_ref[...] = jnp.clip(o, -lim, lim).astype(o_ref.dtype)


# --------------------------------------------------------------------------- #
# Host-side parameter preparation
# --------------------------------------------------------------------------- #
def init_rotater_params(key, input_size=51, num_channels=256, num_blocks=1,
                        is_euler=True):
    """Deterministic synthetic parameters (PyTorch-style init), eval-mode BN stats."""
    output_size = 3 if is_euler else 9

    def linear(k, fan_in, fan_out):
        k1, k2 = jax.random.split(k)
        bound = 1.0 / jnp.sqrt(fan_in)
        w = jax.random.uniform(k1, (fan_in, fan_out), jnp.float32, -bound, bound)
        b = jax.random.uniform(k2, (1, fan_out), jnp.float32, -bound, bound)
        return w, b

    def bn(k, c):
        k1, k2, k3, k4 = jax.random.split(k, 4)
        gamma = 1.0 + 0.1 * jax.random.normal(k1, (1, c), jnp.float32)
        beta = 0.1 * jax.random.normal(k2, (1, c), jnp.float32)
        mean = 0.1 * jax.random.normal(k3, (1, c), jnp.float32)
        var = 1.0 + 0.1 * jax.random.uniform(k4, (1, c), jnp.float32)
        return gamma, beta, mean, var

    keys = jax.random.split(key, 2 + 4 * num_blocks)
    params = []
    wpre, bpre = linear(keys[0], input_size, num_channels)
    params += [wpre, bpre]
    for i in range(num_blocks):
        kk = keys[1 + 4 * i:1 + 4 * (i + 1)]
        w1, b1 = linear(kk[0], num_channels + input_size, num_channels)
        g1, be1, m1, v1 = bn(kk[1], num_channels)
        w2, b2 = linear(kk[2], num_channels, num_channels)
        g2, be2, m2, v2 = bn(kk[3], num_channels)
        params += [w1, b1, g1, be1, m1, v1, w2, b2, g2, be2, m2, v2]
    wout, bout = linear(keys[-1], num_channels, output_size)
    params += [wout, bout]
    return params, output_size


def _fold_bn(w, b, gamma, beta, mean, var):
    """Fold eval-mode BatchNorm into the preceding Linear: y = u @ W' + b'."""
    s = gamma * jax.lax.rsqrt(var + BN_EPS)        # (1, C)
    return w * s, (b - mean) * s + beta


def pack_rotater_params(raw_params, *, input_size, num_channels, num_blocks,
                        output_size, compute_dtype=jnp.bfloat16):
    """Fold BN, split the concat weight, pad K and output lanes, cast weights."""
    k_pad = ((input_size + 63) // 64) * 64         # 51 -> 64 (aligned K for x / w1_x)

    wpre, bpre = raw_params[0], raw_params[1]
    wout, bout = raw_params[-2], raw_params[-1]

    packed = []
    wpre_p = jnp.pad(wpre, ((0, k_pad - input_size), (0, 0)))
    packed += [wpre_p.astype(compute_dtype), bpre.astype(jnp.float32)]

    for blk in range(num_blocks):
        (w1, b1, g1, be1, m1, v1,
         w2, b2, g2, be2, m2, v2) = raw_params[2 + RAW_PARAMS_PER_BLOCK * blk:
                                               2 + RAW_PARAMS_PER_BLOCK * (blk + 1)]
        w1f, b1f = _fold_bn(w1, b1, g1, be1, m1, v1)
        w2f, b2f = _fold_bn(w2, b2, g2, be2, m2, v2)
        w1h = w1f[:num_channels, :]                              # (C, C)
        w1x = jnp.pad(w1f[num_channels:, :],                     # (K_pad, C), zero rows
                      ((0, k_pad - input_size), (0, 0)))
        packed += [w1h.astype(compute_dtype), w1x.astype(compute_dtype),
                   b1f.astype(jnp.float32),
                   w2f.astype(compute_dtype), b2f.astype(jnp.float32)]

    wout_p = jnp.pad(wout, ((0, 0), (0, LANE - output_size)))    # (C, 128)
    bout_p = jnp.pad(bout, ((0, 0), (0, LANE - output_size)))    # (1, 128)
    packed += [wout_p.astype(compute_dtype), bout_p.astype(jnp.float32)]
    return packed, k_pad


# --------------------------------------------------------------------------- #
# Wrapper
# --------------------------------------------------------------------------- #
def rotater_forward(x, packed, *, num_blocks, output_size, is_euler,
                    batch_tile=128, compute_dtype=jnp.bfloat16,
                    vmem_limit_bytes=None):
    bs = x.shape[0]
    x2 = x.reshape(bs, -1).astype(jnp.float32)
    in_features = x2.shape[1]
    k_pad = packed[0].shape[0]                                   # padded K (from wpre)
    num_channels = packed[0].shape[1]
    assert in_features <= k_pad

    tb = batch_tile
    bs_pad = ((bs + tb - 1) // tb) * tb
    # zero-pad features to K_pad and batch to a multiple of the batch tile
    x2 = jnp.pad(x2, ((0, bs_pad - bs), (0, k_pad - in_features))).astype(compute_dtype)

    kernel = functools.partial(rotater_kernel,
                               num_blocks=num_blocks,
                               is_euler=is_euler,
                               compute_dtype=compute_dtype)

    # x / output are tiled over batch; every parameter is one full resident block.
    x_spec = pl.BlockSpec((tb, k_pad), lambda i: (i, 0))
    param_specs = [pl.BlockSpec(p.shape, lambda i: (0, 0)) for p in packed]
    out_spec = pl.BlockSpec((tb, LANE), lambda i: (i, 0))

    compiler_kwargs = dict(dimension_semantics=("parallel",))
    if vmem_limit_bytes is not None:
        # For large num_channels / batch tiles (esp. v5e's 16 MiB default scoped
        # limit) raise this with headroom.
        compiler_kwargs["vmem_limit_bytes"] = vmem_limit_bytes

    out = pl.pallas_call(
        kernel,
        out_shape=jax.ShapeDtypeStruct((bs_pad, LANE), jnp.float32),
        grid_spec=pltpu.PrefetchScalarGridSpec(
            num_scalar_prefetch=0,
            grid=(bs_pad // tb,),
            in_specs=[x_spec] + param_specs,
            out_specs=out_spec,
        ),
        compiler_params=pltpu.CompilerParams(**compiler_kwargs),
    )(x2, *packed)

    # strip batch padding and the lane padding of the output projection
    return out[:bs, :output_size]


# --------------------------------------------------------------------------- #
# References
# --------------------------------------------------------------------------- #
def rotater_reference_fp32(x, raw_params, *, num_blocks, is_euler):
    """Pure-JAX f32 reference of the original module (eval mode)."""
    bs = x.shape[0]
    x = x.reshape(bs, -1).astype(jnp.float32)
    wpre, bpre = raw_params[0], raw_params[1]
    wout, bout = raw_params[-2], raw_params[-1]
    h = x @ wpre + bpre
    for blk in range(num_blocks):
        (w1, b1, g1, be1, m1, v1,
         w2, b2, g2, be2, m2, v2) = raw_params[2 + RAW_PARAMS_PER_BLOCK * blk:
                                               2 + RAW_PARAMS_PER_BLOCK * (blk + 1)]
        t = jnp.concatenate([h, x], axis=-1) @ w1 + b1
        t = g1 * (t - m1) * jax.lax.rsqrt(v1 + BN_EPS) + be1
        t = jnp.maximum(t, 0.0)
        t = t @ w2 + b2
        t = g2 * (t - m2) * jax.lax.rsqrt(v2 + BN_EPS) + be2
        t = jnp.maximum(t, 0.0)
        h = h + t
    o = h @ wout + bout
    lim = PI_HALF if is_euler else 1.0
    return jnp.clip(o, -lim, lim)


def rotater_reference_packed(x, packed, *, num_blocks, output_size, is_euler,
                             compute_dtype=jnp.bfloat16):
    """Pure-JAX emulation of the kernel math (folded BN, bf16 matmuls)."""
    bs = x.shape[0]
    x2 = x.reshape(bs, -1).astype(jnp.float32)
    k_pad = packed[0].shape[0]
    x2 = jnp.pad(x2, ((0, 0), (0, k_pad - x2.shape[1]))).astype(compute_dtype)
    wpre, bpre = packed[0], packed[1]
    wout, bout = packed[-2], packed[-1]
    h = jnp.dot(x2, wpre, preferred_element_type=jnp.float32) + bpre
    for blk in range(num_blocks):
        w1h, w1x, b1, w2, b2 = packed[2 + PACKED_PARAMS_PER_BLOCK * blk:
                                      2 + PACKED_PARAMS_PER_BLOCK * (blk + 1)]
        t = (jnp.dot(h.astype(compute_dtype), w1h, preferred_element_type=jnp.float32)
             + jnp.dot(x2, w1x, preferred_element_type=jnp.float32) + b1)
        t = jnp.maximum(t, 0.0)
        t = jnp.dot(t.astype(compute_dtype), w2, preferred_element_type=jnp.float32) + b2
        t = jnp.maximum(t, 0.0)
        h = h + t
    o = jnp.dot(h.astype(compute_dtype), wout, preferred_element_type=jnp.float32) + bout
    lim = PI_HALF if is_euler else 1.0
    return jnp.clip(o, -lim, lim)[:, :output_size]


# --------------------------------------------------------------------------- #
# Test
# --------------------------------------------------------------------------- #
if __name__ == "__main__":
    # Small shapes consistent with the module: input_size = 17 joints x 3 = 51,
    # reduced hidden width (module default is 1024) for a quick test.
    batch = 8
    num_joints = 17
    input_size = num_joints * 3          # 51
    num_channels = 256
    num_blocks = 2
    is_euler = True
    compute_dtype = jnp.bfloat16

    key = jax.random.PRNGKey(0)
    kx, kp = jax.random.split(key)
    x = jax.random.normal(kx, (batch, num_joints, 3), jnp.float32)

    raw_params, output_size = init_rotater_params(
        kp, input_size=input_size, num_channels=num_channels,
        num_blocks=num_blocks, is_euler=is_euler)

    packed, _ = pack_rotater_params(
        raw_params, input_size=input_size, num_channels=num_channels,
        num_blocks=num_blocks, output_size=output_size,
        compute_dtype=compute_dtype)

    out = rotater_forward(x, packed,
                          num_blocks=num_blocks,
                          output_size=output_size,
                          is_euler=is_euler,
                          batch_tile=128,
                          compute_dtype=compute_dtype)
    out = jax.block_until_ready(out)
    assert out.shape == (batch, output_size)

    # Tight check vs a reference running the exact same folded/bf16 math.
    ref_packed = rotater_reference_packed(
        x, packed, num_blocks=num_blocks, output_size=output_size,
        is_euler=is_euler, compute_dtype=compute_dtype)
    assert jnp.allclose(out, ref_packed, atol=1e-3, rtol=1e-3), \
        "mismatch vs packed (bf16) reference"

    # Loose check vs the original f32 module semantics (bf16 weights only
    # introduce ~1% level numerical differences).
    ref_fp32 = rotater_reference_fp32(
        x, raw_params, num_blocks=num_blocks, is_euler=is_euler)
    assert jnp.allclose(out, ref_fp32, atol=5e-2, rtol=5e-2), \
        "mismatch vs f32 module reference"

    print("KERNEL_OK")
</pallas_src>

<mosaic_0001>
module attributes {stable_mosaic.version = 11 : i64} {
  func.func @rotater_kernel(%arg0: i32, %arg1: memref<128x64xbf16, #tpu.memory_space<vmem>>, %arg2: memref<64x256xbf16, #tpu.memory_space<vmem>>, %arg3: memref<1x256xf32, #tpu.memory_space<vmem>>, %arg4: memref<256x256xbf16, #tpu.memory_space<vmem>>, %arg5: memref<64x256xbf16, #tpu.memory_space<vmem>>, %arg6: memref<1x256xf32, #tpu.memory_space<vmem>>, %arg7: memref<256x256xbf16, #tpu.memory_space<vmem>>, %arg8: memref<1x256xf32, #tpu.memory_space<vmem>>, %arg9: memref<256x256xbf16, #tpu.memory_space<vmem>>, %arg10: memref<64x256xbf16, #tpu.memory_space<vmem>>, %arg11: memref<1x256xf32, #tpu.memory_space<vmem>>, %arg12: memref<256x256xbf16, #tpu.memory_space<vmem>>, %arg13: memref<1x256xf32, #tpu.memory_space<vmem>>, %arg14: memref<256x128xbf16, #tpu.memory_space<vmem>>, %arg15: memref<1x128xf32, #tpu.memory_space<vmem>>, %arg16: memref<128x128xf32, #tpu.memory_space<vmem>>) attributes {dimension_semantics = [#tpu.dimension_semantics<parallel>], iteration_bounds = array<i64: 1>, scalar_prefetch = 0 : i64, scratch_operands = 0 : i64, tpu.core_type = #tpu.core_type<tc>, window_params = [{transform_indices = @transform_0, window_bounds = array<i64: 128, 64>}, {pipeline_mode = #tpu.pipeline_mode<synchronous>, transform_indices = @transform_1, window_bounds = array<i64: 64, 256>}, {pipeline_mode = #tpu.pipeline_mode<synchronous>, transform_indices = @transform_2, window_bounds = array<i64: 1, 256>}, {pipeline_mode = #tpu.pipeline_mode<synchronous>, transform_indices = @transform_3, window_bounds = array<i64: 256, 256>}, {pipeline_mode = #tpu.pipeline_mode<synchronous>, transform_indices = @transform_4, window_bounds = array<i64: 64, 256>}, {pipeline_mode = #tpu.pipeline_mode<synchronous>, transform_indices = @transform_5, window_bounds = array<i64: 1, 256>}, {pipeline_mode = #tpu.pipeline_mode<synchronous>, transform_indices = @transform_6, window_bounds = array<i64: 256, 256>}, {pipeline_mode = #tpu.pipeline_mode<synchronous>, transform_indices = @transform_7, window_bounds = array<i64: 1, 256>}, {pipeline_mode = #tpu.pipeline_mode<synchronous>, transform_indices = @transform_8, window_bounds = array<i64: 256, 256>}, {pipeline_mode = #tpu.pipeline_mode<synchronous>, transform_indices = @transform_9, window_bounds = array<i64: 64, 256>}, {pipeline_mode = #tpu.pipeline_mode<synchronous>, transform_indices = @transform_10, window_bounds = array<i64: 1, 256>}, {pipeline_mode = #tpu.pipeline_mode<synchronous>, transform_indices = @transform_11, window_bounds = array<i64: 256, 256>}, {pipeline_mode = #tpu.pipeline_mode<synchronous>, transform_indices = @transform_12, window_bounds = array<i64: 1, 256>}, {pipeline_mode = #tpu.pipeline_mode<synchronous>, transform_indices = @transform_13, window_bounds = array<i64: 256, 128>}, {pipeline_mode = #tpu.pipeline_mode<synchronous>, transform_indices = @transform_14, window_bounds = array<i64: 1, 128>}, {transform_indices = @transform_15, window_bounds = array<i64: 128, 128>}]} {
    %c0 = arith.constant 0 : index
    %c0_0 = arith.constant 0 : index
    %0 = vector.load %arg1[%c0, %c0_0] : memref<128x64xbf16, #tpu.memory_space<vmem>>, vector<128x64xbf16>
    %c0_1 = arith.constant 0 : index
    %c0_2 = arith.constant 0 : index
    %1 = vector.load %arg2[%c0_1, %c0_2] : memref<64x256xbf16, #tpu.memory_space<vmem>>, vector<64x256xbf16>
    %cst = arith.constant dense<0.000000e+00> : vector<128x256xf32>
    %2 = tpu.matmul %0, %1, %cst {dimension_numbers = #tpu.dot_dimension_numbers<[1], [0], [0], [1], [0, 0, 1, 1], [], []>} : vector<128x64xbf16>, vector<64x256xbf16>, vector<128x256xf32> -> vector<128x256xf32>
    %c0_3 = arith.constant 0 : index
    %c0_4 = arith.constant 0 : index
    %3 = vector.load %arg3[%c0_3, %c0_4] : memref<1x256xf32, #tpu.memory_space<vmem>>, vector<1x256xf32>
    %4 = vector.broadcast %3 : vector<1x256xf32> to vector<128x256xf32>
    %5 = arith.addf %2, %4 : vector<128x256xf32>
    %6 = arith.truncf %5 : vector<128x256xf32> to vector<128x256xbf16>
    %c0_5 = arith.constant 0 : index
    %c0_6 = arith.constant 0 : index
    %7 = vector.load %arg4[%c0_5, %c0_6] : memref<256x256xbf16, #tpu.memory_space<vmem>>, vector<256x256xbf16>
    %cst_7 = arith.constant dense<0.000000e+00> : vector<128x256xf32>
    %8 = tpu.matmul %6, %7, %cst_7 {dimension_numbers = #tpu.dot_dimension_numbers<[1], [0], [0], [1], [0, 0, 1, 1], [], []>} : vector<128x256xbf16>, vector<256x256xbf16>, vector<128x256xf32> -> vector<128x256xf32>
    %c0_8 = arith.constant 0 : index
    %c0_9 = arith.constant 0 : index
    %9 = vector.load %arg5[%c0_8, %c0_9] : memref<64x256xbf16, #tpu.memory_space<vmem>>, vector<64x256xbf16>
    %cst_10 = arith.constant dense<0.000000e+00> : vector<128x256xf32>
    %10 = tpu.matmul %0, %9, %cst_10 {dimension_numbers = #tpu.dot_dimension_numbers<[1], [0], [0], [1], [0, 0, 1, 1], [], []>} : vector<128x64xbf16>, vector<64x256xbf16>, vector<128x256xf32> -> vector<128x256xf32>
    %11 = arith.addf %8, %10 : vector<128x256xf32>
    %c0_11 = arith.constant 0 : index
    %c0_12 = arith.constant 0 : index
    %12 = vector.load %arg6[%c0_11, %c0_12] : memref<1x256xf32, #tpu.memory_space<vmem>>, vector<1x256xf32>
    %13 = vector.broadcast %12 : vector<1x256xf32> to vector<128x256xf32>
    %14 = arith.addf %11, %13 : vector<128x256xf32>
    %cst_13 = arith.constant 0.000000e+00 : f32
    %15 = vector.broadcast %cst_13 : f32 to vector<128x256xf32>
    %16 = arith.maximumf %14, %15 : vector<128x256xf32>
    %17 = arith.truncf %16 : vector<128x256xf32> to vector<128x256xbf16>
    %c0_14 = arith.constant 0 : index
    %c0_15 = arith.constant 0 : index
    %18 = vector.load %arg7[%c0_14, %c0_15] : memref<256x256xbf16, #tpu.memory_space<vmem>>, vector<256x256xbf16>
    %cst_16 = arith.constant dense<0.000000e+00> : vector<128x256xf32>
    %19 = tpu.matmul %17, %18, %cst_16 {dimension_numbers = #tpu.dot_dimension_numbers<[1], [0], [0], [1], [0, 0, 1, 1], [], []>} : vector<128x256xbf16>, vector<256x256xbf16>, vector<128x256xf32> -> vector<128x256xf32>
    %c0_17 = arith.constant 0 : index
    %c0_18 = arith.constant 0 : index
    %20 = vector.load %arg8[%c0_17, %c0_18] : memref<1x256xf32, #tpu.memory_space<vmem>>, vector<1x256xf32>
    %21 = vector.broadcast %20 : vector<1x256xf32> to vector<128x256xf32>
    %22 = arith.addf %19, %21 : vector<128x256xf32>
    %cst_19 = arith.constant 0.000000e+00 : f32
    %23 = vector.broadcast %cst_19 : f32 to vector<128x256xf32>
    %24 = arith.maximumf %22, %23 : vector<128x256xf32>
    %25 = arith.addf %5, %24 : vector<128x256xf32>
    %26 = arith.truncf %25 : vector<128x256xf32> to vector<128x256xbf16>
    %c0_20 = arith.constant 0 : index
    %c0_21 = arith.constant 0 : index
    %27 = vector.load %arg9[%c0_20, %c0_21] : memref<256x256xbf16, #tpu.memory_space<vmem>>, vector<256x256xbf16>
    %cst_22 = arith.constant dense<0.000000e+00> : vector<128x256xf32>
    %28 = tpu.matmul %26, %27, %cst_22 {dimension_numbers = #tpu.dot_dimension_numbers<[1], [0], [0], [1], [0, 0, 1, 1], [], []>} : vector<128x256xbf16>, vector<256x256xbf16>, vector<128x256xf32> -> vector<128x256xf32>
    %c0_23 = arith.constant 0 : index
    %c0_24 = arith.constant 0 : index
    %29 = vector.load %arg10[%c0_23, %c0_24] : memref<64x256xbf16, #tpu.memory_space<vmem>>, vector<64x256xbf16>
    %cst_25 = arith.constant dense<0.000000e+00> : vector<128x256xf32>
    %30 = tpu.matmul %0, %29, %cst_25 {dimension_numbers = #tpu.dot_dimension_numbers<[1], [0], [0], [1], [0, 0, 1, 1], [], []>} : vector<128x64xbf16>, vector<64x256xbf16>, vector<128x256xf32> -> vector<128x256xf32>
    %31 = arith.addf %28, %30 : vector<128x256xf32>
    %c0_26 = arith.constant 0 : index
    %c0_27 = arith.constant 0 : index
    %32 = vector.load %arg11[%c0_26, %c0_27] : memref<1x256xf32, #tpu.memory_space<vmem>>, vector<1x256xf32>
    %33 = vector.broadcast %32 : vector<1x256xf32> to vector<128x256xf32>
    %34 = arith.addf %31, %33 : vector<128x256xf32>
    %cst_28 = arith.constant 0.000000e+00 : f32
    %35 = vector.broadcast %cst_28 : f32 to vector<128x256xf32>
    %36 = arith.maximumf %34, %35 : vector<128x256xf32>
    %37 = arith.truncf %36 : vector<128x256xf32> to vector<128x256xbf16>
    %c0_29 = arith.constant 0 : index
    %c0_30 = arith.constant 0 : index
    %38 = vector.load %arg12[%c0_29, %c0_30] : memref<256x256xbf16, #tpu.memory_space<vmem>>, vector<256x256xbf16>
    %cst_31 = arith.constant dense<0.000000e+00> : vector<128x256xf32>
    %39 = tpu.matmul %37, %38, %cst_31 {dimension_numbers = #tpu.dot_dimension_numbers<[1], [0], [0], [1], [0, 0, 1, 1], [], []>} : vector<128x256xbf16>, vector<256x256xbf16>, vector<128x256xf32> -> vector<128x256xf32>
    %c0_32 = arith.constant 0 : index
    %c0_33 = arith.constant 0 : index
    %40 = vector.load %arg13[%c0_32, %c0_33] : memref<1x256xf32, #tpu.memory_space<vmem>>, vector<1x256xf32>
    %41 = vector.broadcast %40 : vector<1x256xf32> to vector<128x256xf32>
    %42 = arith.addf %39, %41 : vector<128x256xf32>
    %cst_34 = arith.constant 0.000000e+00 : f32
    %43 = vector.broadcast %cst_34 : f32 to vector<128x256xf32>
    %44 = arith.maximumf %42, %43 : vector<128x256xf32>
    %45 = arith.addf %25, %44 : vector<128x256xf32>
    %46 = arith.truncf %45 : vector<128x256xf32> to vector<128x256xbf16>
    %c0_35 = arith.constant 0 : index
    %c0_36 = arith.constant 0 : index
    %47 = vector.load %arg14[%c0_35, %c0_36] : memref<256x128xbf16, #tpu.memory_space<vmem>>, vector<256x128xbf16>
    %cst_37 = arith.constant dense<0.000000e+00> : vector<128x128xf32>
    %48 = tpu.matmul %46, %47, %cst_37 {dimension_numbers = #tpu.dot_dimension_numbers<[1], [0], [0], [1], [0, 0, 1, 1], [], []>} : vector<128x256xbf16>, vector<256x128xbf16>, vector<128x128xf32> -> vector<128x128xf32>
    %c0_38 = arith.constant 0 : index
    %c0_39 = arith.constant 0 : index
    %49 = vector.load %arg15[%c0_38, %c0_39] : memref<1x128xf32, #tpu.memory_space<vmem>>, vector<1x128xf32>
    %50 = vector.broadcast %49 : vector<1x128xf32> to vector<128x128xf32>
    %51 = arith.addf %48, %50 : vector<128x128xf32>
    %cst_40 = arith.constant -1.57079506 : f32
    %cst_41 = arith.constant 1.57079506 : f32
    %52 = vector.broadcast %cst_40 : f32 to vector<128x128xf32>
    %53 = arith.maximumf %52, %51 : vector<128x128xf32>
    %54 = vector.broadcast %cst_41 : f32 to vector<128x128xf32>
    %55 = arith.minimumf %54, %53 : vector<128x128xf32>
    %c0_42 = arith.constant 0 : index
    %c0_43 = arith.constant 0 : index
    %56 = vector.load %arg16[%c0_42, %c0_43] : memref<128x128xf32, #tpu.memory_space<vmem>>, vector<128x128xf32>
    tpu.vector_store %arg16[%c0_42, %c0_43], %55 {strides = array<i32>} : memref<128x128xf32, #tpu.memory_space<vmem>>, vector<128x128xf32>,
    return
  }
  func.func @transform_0(%arg0: i32) -> (i32, i32) {
    %c0_i32 = arith.constant 0 : i32
    %c0_i32_0 = arith.constant 0 : i32
    return %arg0, %c0_i32 : i32, i32
  }
  func.func @transform_1(%arg0: i32) -> (i32, i32) {
    %c0_i32 = arith.constant 0 : i32
    %c0_i32_0 = arith.constant 0 : i32
    %c0_i32_1 = arith.constant 0 : i32
    return %c0_i32, %c0_i32_0 : i32, i32
  }
  func.func @transform_2(%arg0: i32) -> (i32, i32) {
    %c0_i32 = arith.constant 0 : i32
    %c0_i32_0 = arith.constant 0 : i32
    %c0_i32_1 = arith.constant 0 : i32
    return %c0_i32, %c0_i32_0 : i32, i32
  }
  func.func @transform_3(%arg0: i32) -> (i32, i32) {
    %c0_i32 = arith.constant 0 : i32
    %c0_i32_0 = arith.constant 0 : i32
    %c0_i32_1 = arith.constant 0 : i32
    return %c0_i32, %c0_i32_0 : i32, i32
  }
  func.func @transform_4(%arg0: i32) -> (i32, i32) {
    %c0_i32 = arith.constant 0 : i32
    %c0_i32_0 = arith.constant 0 : i32
    %c0_i32_1 = arith.constant 0 : i32
    return %c0_i32, %c0_i32_0 : i32, i32
  }
  func.func @transform_5(%arg0: i32) -> (i32, i32) {
    %c0_i32 = arith.constant 0 : i32
    %c0_i32_0 = arith.constant 0 : i32
    %c0_i32_1 = arith.constant 0 : i32
    return %c0_i32, %c0_i32_0 : i32, i32
  }
  func.func @transform_6(%arg0: i32) -> (i32, i32) {
    %c0_i32 = arith.constant 0 : i32
    %c0_i32_0 = arith.constant 0 : i32
    %c0_i32_1 = arith.constant 0 : i32
    return %c0_i32, %c0_i32_0 : i32, i32
  }
  func.func @transform_7(%arg0: i32) -> (i32, i32) {
    %c0_i32 = arith.constant 0 : i32
    %c0_i32_0 = arith.constant 0 : i32
    %c0_i32_1 = arith.constant 0 : i32
    return %c0_i32, %c0_i32_0 : i32, i32
  }
  func.func @transform_8(%arg0: i32) -> (i32, i32) {
    %c0_i32 = arith.constant 0 : i32
    %c0_i32_0 = arith.constant 0 : i32
    %c0_i32_1 = arith.constant 0 : i32
    return %c0_i32, %c0_i32_0 : i32, i32
  }
  func.func @transform_9(%arg0: i32) -> (i32, i32) {
    %c0_i32 = arith.constant 0 : i32
    %c0_i32_0 = arith.constant 0 : i32
    %c0_i32_1 = arith.constant 0 : i32
    return %c0_i32, %c0_i32_0 : i32, i32
  }
  func.func @transform_10(%arg0: i32) -> (i32, i32) {
    %c0_i32 = arith.constant 0 : i32
    %c0_i32_0 = arith.constant 0 : i32
    %c0_i32_1 = arith.constant 0 : i32
    return %c0_i32, %c0_i32_0 : i32, i32
  }
  func.func @transform_11(%arg0: i32) -> (i32, i32) {
    %c0_i32 = arith.constant 0 : i32
    %c0_i32_0 = arith.constant 0 : i32
    %c0_i32_1 = arith.constant 0 : i32
    return %c0_i32, %c0_i32_0 : i32, i32
  }
  func.func @transform_12(%arg0: i32) -> (i32, i32) {
    %c0_i32 = arith.constant 0 : i32
    %c0_i32_0 = arith.constant 0 : i32
    %c0_i32_1 = arith.constant 0 : i32
    return %c0_i32, %c0_i32_0 : i32, i32
  }
  func.func @transform_13(%arg0: i32) -> (i32, i32) {
    %c0_i32 = arith.constant 0 : i32
    %c0_i32_0 = arith.constant 0 : i32
    %c0_i32_1 = arith.constant 0 : i32
    return %c0_i32, %c0_i32_0 : i32, i32
  }
  func.func @transform_14(%arg0: i32) -> (i32, i32) {
    %c0_i32 = arith.constant 0 : i32
    %c0_i32_0 = arith.constant 0 : i32
    %c0_i32_1 = arith.constant 0 : i32
    return %c0_i32, %c0_i32_0 : i32, i32
  }
  func.func @transform_15(%arg0: i32) -> (i32, i32) {
    %c0_i32 = arith.constant 0 : i32
    %c0_i32_0 = arith.constant 0 : i32
    return %arg0, %c0_i32 : i32, i32
  }
}

</mosaic_0001>

<bundles_post_ra>
// kernel: tpu_custom_call.1
= control target key start
LH: loop header
LB: loop body
LE: loop exit
PB: predicated region body
PF: predicated region fallthrough
CT: control target
= control target key end

     0   :  { %20 = vsyncpa [#allocation3], 0  ;;  %s4181_s0 = inlined_call_operand.vmem [shape: bf16[128,64], index: 0, kind: input, shape index: {}]   ;;  %s4182_s1 = inlined_call_operand.vmem [shape: bf16[64,256], index: 1, kind: input, shape index: {}]   ;;  %s4183_s2 = inlined_call_operand.vmem [shape: f32[1,256], index: 2, kind: input, shape index: {}]   ;;  %s4184_s3 = inlined_call_operand.hbm [shape: bf16[256,256], index: 3, kind: input, shape index: {}]   ;;  %s4185_s4 = inlined_call_operand.hbm [shape: bf16[64,256], index: 4, kind: input, shape index: {}]   ;;  %s4186_s5 = inlined_call_operand.vmem [shape: f32[1,256], index: 5, kind: input, shape index: {}]   ;;  %s4187_s6 = inlined_call_operand.hbm [shape: bf16[256,256], index: 6, kind: input, shape index: {}]   ;;  %s4188_s7 = inlined_call_operand.vmem [shape: f32[1,256], index: 7, kind: input, shape index: {}]   ;;  %s4189_s8 = inlined_call_operand.hbm [shape: bf16[256,256], index: 8, kind: input, shape index: {}]   ;;  %s4190_s9 = inlined_call_operand.hbm [shape: bf16[64,256], index: 9, kind: input, shape index: {}]   ;;  %s4191_s10 = inlined_call_operand.vmem [shape: f32[1,256], index: 10, kind: input, shape index: {}]   ;;  %s4192_s11 = inlined_call_operand.hbm [shape: bf16[256,256], index: 11, kind: input, shape index: {}]   ;;  %s4193_s12 = inlined_call_operand.vmem [shape: f32[1,256], index: 12, kind: input, shape index: {}]   ;;  %s4194_s13 = inlined_call_operand.hbm [shape: bf16[256,128], index: 13, kind: input, shape index: {}]   ;;  %s4195_s14 = inlined_call_operand.vmem [shape: f32[1,128], index: 14, kind: input, shape index: {}]   ;;  %s4196_s15 = inlined_call_operand.hbm [shape: f32[128,128], index: 15, kind: output, shape index: {}]  }
   0x1   :  { %21 = vsyncpa [#allocation6], 0 }
   0x2   :  { %22 = vsyncpa [#allocation9], 0 }
   0x3   :  { %23 = vsyncpa [#allocation12], 0 }
   0x4   :  { %24 = vsyncpa [#allocation4], 0  ;;  %s3343_s18 = smov [#allocation5]   ;;  %s3344_s20 = smov [#allocation8]  }
   0x5   :  { %s48_s19 = sshll.u32 %s3343_s18, 4  ;;  %s76_s21 = sshll.u32 %s3344_s20, 4  ;;  %s49_s19 = int_to_ptr.vmem [resolvable:$true] %s48_s19  ;;  %s77_s21 = int_to_ptr.vmem [resolvable:$true] %s76_s21 }
   0x6   :  { %s3181_s22 = scalar_lea.vmem %s49_s19, 1024  ;;  %p3186_p1 = scmp.lt.s32.totalorder %s49_s19, %s49_s19 }
   0x7   :  { %p3182_p0 = scmp.ne.s32.totalorder %s49_s19, %s3181_s22  ;;  %p3187_p2 = scmp.lt.s32.totalorder %s3181_s22, %s3181_s22 }
   0x9   :  { %p3188_p3 = por %p3187_p2, %p3186_p1 }
   0xb   :  { %p3189_p4 = pnand %p3188_p3, %p3182_p0 }
   0xd   :  { %3192 = shalt.err (!%p3189_p4)
}
   0xe   :  { %s3345_s23 = smov 128   ;;  %s3346_s24 = smov 8  }
   0xf   :  { %54 = dma.hbm_to_vmem [thread:$0]  %s4185_s4, 1024, %s49_s19, [#allocation6], %s3345_s23, %s3345_s23, %s3346_s24  }
  0x10   :  { %s3201_s27 = scalar_lea.vmem %s77_s21, 4096  ;;  %p3206_p6 = scmp.lt.s32.totalorder %s77_s21, %s77_s21 }
  0x11   :  { %p3202_p5 = scmp.ne.s32.totalorder %s77_s21, %s3201_s27  ;;  %p3207_p7 = scmp.lt.s32.totalorder %s3201_s27, %s3201_s27 }
  0x13   :  { %p3208_p8 = por %p3207_p7, %p3206_p6 }
  0x15   :  { %p3209_p9 = pnand %p3208_p8, %p3202_p5 }
  0x17   :  { %3212 = shalt.err (!%p3209_p9)
}
  0x18   :  { %82 = dma.hbm_to_vmem [thread:$0]  %s4189_s8, 4096, %s77_s21, [#allocation9], %s3345_s23, %s3345_s23, %s3346_s24  }
  0x19   :  { %s3347_s30 = smov [#allocation11]   ;;  %s3348_s17 = smov [#allocation2]  }
  0x1a   :  { %s102_s16 = sshll.u32 %s3347_s30, 4  ;;  %s36_s18 = sshll.u32 %s3348_s17, 4  ;;  %s103_s16 = int_to_ptr.vmem [resolvable:$true] %s102_s16  ;;  %s37_s18 = int_to_ptr.vmem [resolvable:$true] %s36_s18 }
  0x1b   :  { %s3221_s4 = scalar_lea.vmem %s103_s16, 4096  ;;  %p3226_p11 = scmp.lt.s32.totalorder %s103_s16, %s103_s16 }
  0x1c   :  { %p3222_p10 = scmp.ne.s32.totalorder %s103_s16, %s3221_s4  ;;  %p3227_p12 = scmp.lt.s32.totalorder %s3221_s4, %s3221_s4 }
  0x1e   :  { %p3228_p13 = por %p3227_p12, %p3226_p11 }
  0x20   :  { %p3229_p0 = pnand %p3228_p13, %p3222_p10 }
  0x22   :  { %3232 = shalt.err (!%p3229_p0)
}
  0x23   :  { %108 = dma.hbm_to_vmem [thread:$0]  %s4192_s11, 4096, %s103_s16, [#allocation12], %s3345_s23, %s3345_s23, %s3346_s24  }
  0x24   :  { %s3241_s8 = scalar_lea.vmem %s37_s18, 4096  ;;  %p3246_p2 = scmp.lt.s32.totalorder %s37_s18, %s37_s18 }
  0x25   :  { %p3242_p1 = scmp.ne.s32.totalorder %s37_s18, %s3241_s8  ;;  %p3247_p3 = scmp.lt.s32.totalorder %s3241_s8, %s3241_s8 }
  0x27   :  { %p3248_p4 = por %p3247_p3, %p3246_p2 }
  0x29   :  { %p3249_p5 = pnand %p3248_p4, %p3242_p1 }
  0x2b   :  { %3252 = shalt.err (!%p3249_p5)
}
  0x2c   :  { %42 = dma.hbm_to_vmem [thread:$0]  %s4184_s3, 4096, %s37_s18, [#allocation3], %s3345_s23, %s3345_s23, %s3346_s24  }
  0x2d   :  { %s3349_s25 = smov [#allocation7]   ;;  %s3350_s27 = smov [#allocation10]  }
  0x2e   :  { %s62_s26 = sshll.u32 %s3349_s25, 4  ;;  %s88_s28 = sshll.u32 %s3350_s27, 4  ;;  %s63_s26 = int_to_ptr.vmem [resolvable:$true] %s62_s26  ;;  %s89_s28 = int_to_ptr.vmem [resolvable:$true] %s88_s28 }
  0x2f   :  { %s3261_s11 = scalar_lea.vmem %s63_s26, 4096  ;;  %p3266_p7 = scmp.lt.s32.totalorder %s63_s26, %s63_s26 }
  0x30   :  { %p3262_p6 = scmp.ne.s32.totalorder %s63_s26, %s3261_s11  ;;  %p3267_p8 = scmp.lt.s32.totalorder %s3261_s11, %s3261_s11 }
  0x32   :  { %p3268_p9 = por %p3267_p8, %p3266_p7 }
  0x34   :  { %p3269_p10 = pnand %p3268_p9, %p3262_p6 }
  0x36   :  { %3272 = shalt.err (!%p3269_p10)
}
  0x37   :  { %68 = dma.hbm_to_vmem [thread:$0]  %s4187_s6, 4096, %s63_s26, [#allocation6], %s3345_s23, %s3345_s23, %s3346_s24  }
  0x38   :  { %s3281_s3 = scalar_lea.vmem %s89_s28, 1024  ;;  %p3286_p12 = scmp.lt.s32.totalorder %s89_s28, %s89_s28 }
  0x39   :  { %p3282_p11 = scmp.ne.s32.totalorder %s89_s28, %s3281_s3  ;;  %p3287_p13 = scmp.lt.s32.totalorder %s3281_s3, %s3281_s3 }
  0x3b   :  { %p3288_p0 = por %p3287_p13, %p3286_p12 }
  0x3d   :  { %p3289_p1 = pnand %p3288_p0, %p3282_p11 }
  0x3f   :  { %3292 = shalt.err (!%p3289_p1)
}
  0x40   :  { %94 = dma.hbm_to_vmem [thread:$0]  %s4190_s9, 1024, %s89_s28, [#allocation9], %s3345_s23, %s3345_s23, %s3346_s24  }
  0x41   :  { %s3351_s18 = smov [#allocation13]  }
  0x42   :  { %s116_s4 = sshll.u32 %s3351_s18, 4  ;;  %s117_s4 = int_to_ptr.vmem [resolvable:$true] %s116_s4 }
  0x43   :  { %s3301_s19 = scalar_lea.vmem %s117_s4, 2048  ;;  %p3306_p3 = scmp.lt.s32.totalorder %s117_s4, %s117_s4 }
  0x44   :  { %p3302_p2 = scmp.ne.s32.totalorder %s117_s4, %s3301_s19  ;;  %p3307_p4 = scmp.lt.s32.totalorder %s3301_s19, %s3301_s19 }
  0x46   :  { %p3308_p5 = por %p3307_p4, %p3306_p3 }
  0x48   :  { %p3309_p6 = pnand %p3308_p5, %p3302_p2 }
  0x4a   :  { %3312 = shalt.err (!%p3309_p6)
}
  0x4b   :  { %s3352_s6 = smov 64   ;;  %s3353_s20 = smov 4  }
  0x4c   :  { %122 = dma.hbm_to_vmem [thread:$0]  %s4194_s13, 2048, %s117_s4, [#allocation12], %s3352_s6, %s3352_s6, %s3353_s20  }
  0x4d   :  { %3333 = dma.done.wait [#allocation3], 4096  }
  0x4e   :  { %3334 = vsyncadd [#allocation3], 4294963200 }
  0x4f   :  { %3335 = dma.done.wait [#allocation6], 5120  }
  0x50   :  { %3336 = vsyncadd [#allocation6], 4294962176 }
  0x51   :  { %3337 = dma.done.wait [#allocation9], 5120  }
  0x52   :  { %3338 = vsyncadd [#allocation9], 4294962176 }
  0x53   :  { %3339 = dma.done.wait [#allocation12], 6144  }
  0x54   :  { %3340 = vsyncadd [#allocation12], 4294961152  ;;  %v4202_v0 = vmov 0   ;;  %v2921_v1 = vld [vmem:[%s4182_s1 + $0x34] ss:$8 sps:$4 sm:$0xff]   ;;  %v3504_v9 = vld [vmem:[%s4181_s0] sm:$0xff]  }
  0x55   :  { %320 = vmatprep.mubr.bf16.mxu0 %v4202_v0  ;;  %529 = vmatprep.mubr.bf16.mxu1 %v4202_v0  ;;  %v2923_v2 = vld [vmem:[%s4182_s1 + $0x30] ss:$8 sps:$4 sm:$0xff]   ;;  %v2924_v3 = vld [vmem:[%s4182_s1 + $0x24] ss:$8 sps:$4 sm:$0xff]   ;;  %v2926_v4 = vld [vmem:[%s4182_s1 + $0x20] ss:$8 sps:$4 sm:$0xff]  }
  0x56   :  { %296 = vmatprep.subr.bf16.mxu0 %v2921_v1  ;;  %v2927_v5 = vld [vmem:[%s4182_s1 + $0x14] ss:$8 sps:$4 sm:$0xff]   ;;  %v2929_v6 = vld [vmem:[%s4182_s1 + $0x10] ss:$8 sps:$4 sm:$0xff]   ;;  %v2930_v7 = vld [vmem:[%s4182_s1 + $0x4] ss:$8 sps:$4 sm:$0xff]  }
  0x57   :  { %297 = vmatpush1.bf16.msra.mxu0 %v2923_v2  ;;  %v2932_v8 = vld [vmem:[%s4182_s1] ss:$8 sps:$4 sm:$0xff]   ;;  %v2943_v10 = vld [vmem:[#allocation2 + $0x74] ss:$8 sps:$4 sm:$0xff]   ;;  %vm263_vm0 = vcmask 523264  }
  0x58   :  { %298 = vmatprep.subr.bf16.mxu0 %v2924_v3  ;;  %v2941_v11 = vld [vmem:[#allocation2 + $0x70] ss:$8 sps:$4 sm:$0xff]   ;;  %v2946_v12 = vld [vmem:[#allocation2 + $0x64] ss:$8 sps:$4 sm:$0xff]   ;;  %v2944_v13 = vld [vmem:[#allocation2 + $0x60] ss:$8 sps:$4 sm:$0xff]  }
  0x59   :  { %v2949_v14 = vld [vmem:[#allocation2 + $0x54] ss:$8 sps:$4 sm:$0xff]   ;;  %v3512_v15 = vld [vmem:[%s4181_s0 + $0x8] sm:$0xff]   ;;  %v2947_v16 = vld [vmem:[#allocation2 + $0x50] ss:$8 sps:$4 sm:$0xff]  }
  0x5a   :  { %v2952_v17 = vld [vmem:[#allocation2 + $0x44] ss:$8 sps:$4 sm:$0xff]   ;;  %v2950_v18 = vld [vmem:[#allocation2 + $0x40] ss:$8 sps:$4 sm:$0xff]   ;;  %v2955_v19 = vld [vmem:[#allocation2 + $0x34] ss:$8 sps:$4 sm:$0xff]  }
  0x5b   :  { %299 = vmatpush1.bf16.msra.mxu0 %v2926_v4  ;;  %v2974_v20 = vld [vmem:[#allocation5 + $0x34] ss:$8 sps:$4 sm:$0xff]   ;;  %v2976_v21 = vld [vmem:[#allocation5 + $0x30] ss:$8 sps:$4 sm:$0xff]   ;;  %v2958_v24 = vld [vmem:[#allocation2 + $0x24] ss:$8 sps:$4 sm:$0xff]  }
  0x5c   :  { %300 = vmatprep.subr.bf16.mxu0 %v2927_v5  ;;  %v3520_v22 = vld [vmem:[%s4181_s0 + $0x10] sm:$0xff]   ;;  %505 = vmatprep.subr.bf16.mxu1 %v2974_v20  ;;  %v2980_v25 = vld [vmem:[#allocation5 + $0x24] ss:$8 sps:$4 sm:$0xff]   ;;  %v2982_v26 = vld [vmem:[#allocation5 + $0x20] ss:$8 sps:$4 sm:$0xff]  }
  0x5d   :  { %v2953_v23 = vld [vmem:[#allocation2 + $0x30] ss:$8 sps:$4 sm:$0xff]   ;;  %506 = vmatpush1.bf16.msra.mxu1 %v2976_v21  ;;  %v2986_v27 = vld [vmem:[#allocation5 + $0x14] ss:$8 sps:$4 sm:$0xff]   ;;  %v2956_v28 = vld [vmem:[#allocation2 + $0x20] ss:$8 sps:$4 sm:$0xff]  }
  0x5e   :  { %507 = vmatprep.subr.bf16.mxu1 %v2980_v25  ;;  %v2961_v29 = vld [vmem:[#allocation2 + $0x14] ss:$8 sps:$4 sm:$0xff]   ;;  %v2988_v31 = vld [vmem:[#allocation5 + $0x10] ss:$8 sps:$4 sm:$0xff]   ;;  %v2964_v33 = vld [vmem:[#allocation2 + $0x4] ss:$8 sps:$4 sm:$0xff]  }
  0x5f   :  { %301 = vmatpush1.bf16.msra.mxu0 %v2929_v6  ;;  %v3528_v30 = vld [vmem:[%s4181_s0 + $0x18] sm:$0xff]   ;;  %v2962_v34 = vld [vmem:[#allocation2] ss:$8 sps:$4 sm:$0xff]   ;;  %v2970_v38 = vld [vmem:[#allocation2 + $0xe4] ss:$8 sps:$4 sm:$0xff]  }
  0x60   :  { %302 = vmatprep.subr.bf16.mxu0 %v2930_v7  ;;  %v2959_v32 = vld [vmem:[#allocation2 + $0x10] ss:$8 sps:$4 sm:$0xff]   ;;  %v2967_v35 = vld [vmem:[#allocation2 + $0xf4] ss:$8 sps:$4 sm:$0xff]   ;;  %v3536_v36 = vld [vmem:[%s4181_s0 + $0x20] sm:$0xff]  }
  0x61   :  { %508 = vmatpush1.bf16.msra.mxu1 %v2982_v26  ;;  %v2965_v37 = vld [vmem:[#allocation2 + $0xf0] ss:$8 sps:$4 sm:$0xff]   ;;  %v2968_v39 = vld [vmem:[#allocation2 + $0xe0] ss:$8 sps:$4 sm:$0xff]   ;;  %v2973_v40 = vld [vmem:[#allocation2 + $0xd4] ss:$8 sps:$4 sm:$0xff]  }
  0x62   :  { %509 = vmatprep.subr.bf16.mxu1 %v2986_v27  ;;  %v3544_v41 = vld [vmem:[%s4181_s0 + $0x28] sm:$0xff]   ;;  %v2971_v42 = vld [vmem:[#allocation2 + $0xd0] ss:$8 sps:$4 sm:$0xff]   ;;  %v2985_v45 = vld [vmem:[#allocation2 + $0xb4] ss:$8 sps:$4 sm:$0xff]  }
  0x63   :  { %303 = vmatpush1.bf16.msra.mxu0 %v2932_v8  ;;  %v2979_v43 = vld [vmem:[#allocation2 + $0xc4] ss:$8 sps:$4 sm:$0xff]   ;;  %v2977_v44 = vld [vmem:[#allocation2 + $0xc0] ss:$8 sps:$4 sm:$0xff]   ;;  %v3552_v46 = vld [vmem:[%s4181_s0 + $0x30] sm:$0xff]  }
  0x64   :  { %770 = vmatprep.subr.bf16.mxu0 %v2943_v10  ;;  %v2983_v47 = vld [vmem:[#allocation2 + $0xb0] ss:$8 sps:$4 sm:$0xff]   ;;  %v2991_v48 = vld [vmem:[#allocation2 + $0xa4] ss:$8 sps:$4 sm:$0xff]   ;;  %v2989_v49 = vld [vmem:[#allocation2 + $0xa0] ss:$8 sps:$4 sm:$0xff]  }
  0x65   :  { %510 = vmatpush1.bf16.msra.mxu1 %v2988_v31  ;;  %v3560_v50 = vld [vmem:[%s4181_s0 + $0x38] sm:$0xff]   ;;  %v2992_v51 = vld [vmem:[#allocation5 + $0x4] ss:$8 sps:$4 sm:$0xff]   ;;  %v2994_v52 = vld [vmem:[#allocation5] ss:$8 sps:$4 sm:$0xff]  }
  0x66   :  { %2643 = vmatmul.mubr.msk.bf16.vlgmr.msra.gmra.mxu0 %vm263_vm0, %v3504_v9  ;;  %511 = vmatprep.subr.bf16.mxu1 %v2992_v51  ;;  %v2997_v53 = vld [vmem:[#allocation2 + $0x94] ss:$8 sps:$4 sm:$0xff]   ;;  %v2995_v54 = vld [vmem:[#allocation2 + $0x90] ss:$8 sps:$4 sm:$0xff]   ;;  %v3000_v55 = vld [vmem:[#allocation2 + $0x84] ss:$8 sps:$4 sm:$0xff]  }
  0x67   :  { %330 = vmatprep.mubr.bf16.mxu0 %v4202_v0  ;;  %771 = vmatpush1.bf16.msra.mxu0 %v2941_v11  ;;  %v2998_v56 = vld [vmem:[#allocation2 + $0x80] ss:$8 sps:$4 sm:$0xff]   ;;  %v3001_v57 = vld [vmem:[#allocation7 + $0x70] ss:$8 sps:$4 sm:$0xff]   ;;  %v3003_v58 = vld [vmem:[#allocation7 + $0x74] ss:$8 sps:$4 sm:$0xff]  }
  0x68   :  { %772 = vmatprep.subr.bf16.mxu0 %v2946_v12  ;;  %v3006_v59 = vld [vmem:[#allocation7 + $0x64] ss:$8 sps:$4 sm:$0xff]   ;;  %v3004_v60 = vld [vmem:[#allocation7 + $0x60] ss:$8 sps:$4 sm:$0xff]   ;;  %v3009_v61 = vld [vmem:[#allocation7 + $0x54] ss:$8 sps:$4 sm:$0xff]  }
  0x69   :  { %512 = vmatpush1.bf16.msra.mxu1 %v2994_v52  ;;  %v3007_v62 = vld [vmem:[#allocation7 + $0x50] ss:$8 sps:$4 sm:$0xff]   ;;  %v3012_v63 = vld [vmem:[#allocation7 + $0x44] ss:$8 sps:$4 sm:$0xff]   ;;  %v3010_v1 = vld [vmem:[#allocation7 + $0x40] ss:$8 sps:$4 sm:$0xff]  }
  0x6a   :  { %1179 = vmatprep.subr.bf16.mxu1 %v3003_v58  ;;  %v3015_v2 = vld [vmem:[#allocation7 + $0x34] ss:$8 sps:$4 sm:$0xff]   ;;  %v3013_v3 = vld [vmem:[#allocation7 + $0x30] ss:$8 sps:$4 sm:$0xff]   ;;  %v3018_v4 = vld [vmem:[#allocation7 + $0x24] ss:$8 sps:$4 sm:$0xff]  }
  0x6b   :  { %773 = vmatpush1.bf16.msra.mxu0 %v2944_v13  ;;  %v3016_v5 = vld [vmem:[#allocation7 + $0x20] ss:$8 sps:$4 sm:$0xff]   ;;  %v3021_v6 = vld [vmem:[#allocation7 + $0x14] ss:$8 sps:$4 sm:$0xff]   ;;  %v3019_v7 = vld [vmem:[#allocation7 + $0x10] ss:$8 sps:$4 sm:$0xff]  }
  0x6c   :  { %774 = vmatprep.subr.bf16.mxu0 %v2949_v14  ;;  %2659 = vmatmul.mubr.msk.bf16.vlgmr.msra.gmra.mxu1 %vm263_vm0, %v3504_v9  ;;  %v3024_v8 = vld [vmem:[#allocation7 + $0x4] ss:$8 sps:$4 sm:$0xff]   ;;  %v3022_v10 = vld [vmem:[#allocation7] ss:$8 sps:$4 sm:$0xff]   ;;  %v3027_v11 = vld [vmem:[#allocation7 + $0xf4] ss:$8 sps:$4 sm:$0xff]  }
  0x6d   :  { %539 = vmatprep.mubr.bf16.mxu1 %v4202_v0  ;;  %1180 = vmatpush1.bf16.msra.mxu1 %v3001_v57  ;;  %v3025_v12 = vld [vmem:[#allocation7 + $0xf0] ss:$8 sps:$4 sm:$0xff]   ;;  %v3030_v13 = vld [vmem:[#allocation7 + $0xe4] ss:$8 sps:$4 sm:$0xff]   ;;  %v3028_v14 = vld [vmem:[#allocation7 + $0xe0] ss:$8 sps:$4 sm:$0xff]  }
  0x6e   :  { %2644 = vmatmul.mubr.msk.bf16.gmra.mxu0 %vm263_vm0, %v3512_v15  ;;  %1181 = vmatprep.subr.bf16.mxu1 %v3006_v59  ;;  %v3039_v20 = vld [vmem:[#allocation7 + $0xb4] ss:$8 sps:$4 sm:$0xff]   ;;  %v3037_v21 = vld [vmem:[#allocation7 + $0xb0] ss:$8 sps:$4 sm:$0xff]  }
  0x6f   :  { %340 = vmatprep.mubr.bf16.mxu0 %v4202_v0  ;;  %775 = vmatpush1.bf16.msra.mxu0 %v2947_v16  ;;  %v3033_v16 = vld [vmem:[#allocation7 + $0xd4] ss:$8 sps:$4 sm:$0xff]  }
  0x70   :  { %776 = vmatprep.subr.bf16.mxu0 %v2952_v17  ;;  %v3031_v17 = vld [vmem:[#allocation7 + $0xd0] ss:$8 sps:$4 sm:$0xff]  }
  0x71   :  { %1182 = vmatpush1.bf16.msra.mxu1 %v3004_v60 }
  0x72   :  { %1183 = vmatprep.subr.bf16.mxu1 %v3009_v61 }
  0x73   :  { %777 = vmatpush1.bf16.msra.mxu0 %v2950_v18  ;;  %v3036_v18 = vld [vmem:[#allocation7 + $0xc4] ss:$8 sps:$4 sm:$0xff]  }
  0x74   :  { %778 = vmatprep.subr.bf16.mxu0 %v2955_v19  ;;  %2660 = vmatmul.mubr.msk.bf16.gmra.mxu1 %vm263_vm0, %v3512_v15  ;;  %v3034_v19 = vld [vmem:[#allocation7 + $0xc0] ss:$8 sps:$4 sm:$0xff]  }
  0x75   :  { %549 = vmatprep.mubr.bf16.mxu1 %v4202_v0  ;;  %1184 = vmatpush1.bf16.msra.mxu1 %v3007_v62 }
  0x76   :  { %2645 = vmatmul.mubr.msk.bf16.gmra.mxu0 %vm263_vm0, %v3520_v22  ;;  %1185 = vmatprep.subr.bf16.mxu1 %v3012_v63 }
  0x77   :  { %350 = vmatprep.mubr.bf16.mxu0 %v4202_v0  ;;  %779 = vmatpush1.bf16.msra.mxu0 %v2953_v23  ;;  %v173_v23 = vlaneseq }
  0x78   :  { %780 = vmatprep.subr.bf16.mxu0 %v2958_v24 }
  0x79   :  { %1186 = vmatpush1.bf16.msra.mxu1 %v3010_v1  ;;  %v174_v24 = vshrl.u32 %v173_v23, 7 }
  0x7a   :  { %1187 = vmatprep.subr.bf16.mxu1 %v3015_v2 }
  0x7b   :  { %781 = vmatpush1.bf16.msra.mxu0 %v2956_v28  ;;  %v3587_v25 = vsub.s32 1, %v174_v24  ;;  %v3589_v26 = vsub.s32 0, %v174_v24  ;;  %v171_v28 = vld [vmem:[%s4183_s2] sm:$0x3] }
  0x7c   :  { %782 = vmatprep.subr.bf16.mxu0 %v2961_v29  ;;  %2661 = vmatmul.mubr.msk.bf16.gmra.mxu1 %vm263_vm0, %v3520_v22 }
  0x7d   :  { %559 = vmatprep.mubr.bf16.mxu1 %v4202_v0  ;;  %1188 = vmatpush1.bf16.msra.mxu1 %v3013_v3  ;;  %v3595_v31 = vrot.slane %v171_v28, %v3587_v25 }
  0x7e   :  { %2646 = vmatmul.mubr.msk.bf16.gmra.mxu0 %vm263_vm0, %v3528_v30  ;;  %1189 = vmatprep.subr.bf16.mxu1 %v3018_v4 }
  0x7f   :  { %360 = vmatprep.mubr.bf16.mxu0 %v4202_v0  ;;  %783 = vmatpush1.bf16.msra.mxu0 %v2959_v32  ;;  %v3598_v32 = vrot.slane %v171_v28, %v3589_v26 }
  0x80   :  { %784 = vmatprep.subr.bf16.mxu0 %v2964_v33 }
  0x81   :  { %1190 = vmatpush1.bf16.msra.mxu1 %v3016_v5 }
  0x82   :  { %1191 = vmatprep.subr.bf16.mxu1 %v3021_v6 }
  0x83   :  { %785 = vmatpush1.bf16.msra.mxu0 %v2962_v34 }
  0x84   :  { %786 = vmatprep.subr.bf16.mxu0 %v2967_v35  ;;  %2662 = vmatmul.mubr.msk.bf16.gmra.mxu1 %vm263_vm0, %v3528_v30 }
  0x85   :  { %569 = vmatprep.mubr.bf16.mxu1 %v4202_v0  ;;  %1192 = vmatpush1.bf16.msra.mxu1 %v3019_v7 }
  0x86   :  { %2647 = vmatmul.mubr.msk.bf16.gmra.mxu0 %vm263_vm0, %v3536_v36  ;;  %1193 = vmatprep.subr.bf16.mxu1 %v3024_v8 }
  0x87   :  { %370 = vmatprep.mubr.bf16.mxu0 %v4202_v0  ;;  %787 = vmatpush2.bf16.msra.mxu0 %v2965_v37 }
  0x88   :  { %788 = vmatprep.subr.bf16.mxu0 %v2970_v38 }
  0x89   :  { %1194 = vmatpush1.bf16.msra.mxu1 %v3022_v10 }
  0x8a   :  { %1195 = vmatprep.subr.bf16.mxu1 %v3027_v11 }
  0x8b   :  { %789 = vmatpush2.bf16.msra.mxu0 %v2968_v39 }
  0x8c   :  { %790 = vmatprep.subr.bf16.mxu0 %v2973_v40  ;;  %2663 = vmatmul.mubr.msk.bf16.gmra.mxu1 %vm263_vm0, %v3536_v36 }
  0x8d   :  { %579 = vmatprep.mubr.bf16.mxu1 %v4202_v0  ;;  %1196 = vmatpush2.bf16.msra.mxu1 %v3025_v12 }
  0x8e   :  { %2648 = vmatmul.mubr.msk.bf16.gmra.mxu0 %vm263_vm0, %v3544_v41  ;;  %1197 = vmatprep.subr.bf16.mxu1 %v3030_v13 }
  0x8f   :  { %380 = vmatprep.mubr.bf16.mxu0 %v4202_v0  ;;  %791 = vmatpush2.bf16.msra.mxu0 %v2971_v42 }
  0x90   :  { %792 = vmatprep.subr.bf16.mxu0 %v2979_v43 }
  0x91   :  { %1198 = vmatpush2.bf16.msra.mxu1 %v3028_v14 }
  0x92   :  { %1199 = vmatprep.subr.bf16.mxu1 %v3033_v16 }
  0x93   :  { %793 = vmatpush2.bf16.msra.mxu0 %v2977_v44 }
  0x94   :  { %794 = vmatprep.subr.bf16.mxu0 %v2985_v45  ;;  %2664 = vmatmul.mubr.msk.bf16.gmra.mxu1 %vm263_vm0, %v3544_v41 }
  0x95   :  { %589 = vmatprep.mubr.bf16.mxu1 %v4202_v0  ;;  %1200 = vmatpush2.bf16.msra.mxu1 %v3031_v17 }
  0x96   :  { %2649 = vmatmul.mubr.msk.bf16.gmra.mxu0 %vm263_vm0, %v3552_v46  ;;  %1201 = vmatprep.subr.bf16.mxu1 %v3036_v18 }
  0x97   :  { %390 = vmatprep.mubr.bf16.mxu0 %v4202_v0  ;;  %795 = vmatpush2.bf16.msra.mxu0 %v2983_v47 }
  0x98   :  { %796 = vmatprep.subr.bf16.mxu0 %v2991_v48 }
  0x99   :  { %1202 = vmatpush2.bf16.msra.mxu1 %v3034_v19 }
  0x9a   :  { %1203 = vmatprep.subr.bf16.mxu1 %v3039_v20 }
  0x9b   :  { %797 = vmatpush2.bf16.msra.mxu0 %v2989_v49 }
  0x9c   :  { %798 = vmatprep.subr.bf16.mxu0 %v2997_v53  ;;  %2665 = vmatmul.mubr.msk.bf16.gmra.mxu1 %vm263_vm0, %v3552_v46 }
  0x9d   :  { %599 = vmatprep.mubr.bf16.mxu1 %v4202_v0  ;;  %1204 = vmatpush2.bf16.msra.mxu1 %v3037_v21 }
  0x9e   :  { %2650 = vmatmul.mubr.msk.bf16.gmra.mxu0 %vm263_vm0, %v3560_v50 }
  0x9f   :  { %799 = vmatpush2.bf16.msra.mxu0 %v2995_v54 }
  0xa0   :  { %800 = vmatprep.subr.bf16.mxu0 %v3000_v55 }
  0xa3   :  { %801 = vmatpush2.bf16.msra.mxu0 %v2998_v56 }
  0xa4   :  { %2666 = vmatmul.mubr.msk.bf16.gmra.mxu1 %vm263_vm0, %v3560_v50 }
 0x126   :  { %v322_v27 = vpop.f32.mrf.mxu0 }
 0x127   :  { %v3610_v39 = vadd.f32 %v322_v27, %v3598_v32 }
 0x128   :  { %v324_v29 = vpop.f32.mrf.mxu0 }
 0x129   :  { %v3604_v37 = vadd.f32 %v324_v29, %v3595_v31 }
 0x12a   :  { %v326_v33 = vpop.f32.mrf.mxu0 }
 0x12b   :  { %v3601_v34 = vadd.f32 %v326_v33, %v3598_v32 }
 0x12c   :  { %v328_v35 = vpop.f32.mrf.mxu0 }
 0x12d   :  { %v3607_v38 = vadd.f32 %v328_v35, %v3595_v31  ;;  %v401_v43 = vpack.c.bf16 %v3601_v34, %v3610_v39 }
 0x12e   :  { %v332_v40 = vpop.f32.mrf.mxu0 }
 0x12f   :  { %v402_v42 = vpack.c.bf16 %v3607_v38, %v3604_v37  ;;  %v3626_v52 = vadd.f32 %v332_v40, %v3598_v32 }
 0x130   :  { %v334_v44 = vpop.f32.mrf.mxu0 }
 0x131   :  { %802 = vmatprep.mubr.bf16.mxu0 %v402_v42  ;;  %v3620_v49 = vadd.f32 %v334_v44, %v3595_v31 }
 0x132   :  { %v336_v45 = vpop.f32.mrf.mxu0  ;;  %803 = vmatmul.mubr.bf16.vlgmr.msra.gmra.mxu0 %v401_v43 }
 0x133   :  { %v3617_v47 = vadd.f32 %v336_v45, %v3598_v32 }
 0x134   :  { %v338_v48 = vpop.f32.mrf.mxu0 }
 0x135   :  { %v3623_v51 = vadd.f32 %v338_v48, %v3595_v31  ;;  %v403_v55 = vpack.c.bf16 %v3617_v47, %v3626_v52 }
 0x136   :  { %v342_v53 = vpop.f32.mrf.mxu0 }
 0x137   :  { %v404_v54 = vpack.c.bf16 %v3623_v51, %v3620_v49  ;;  %v3642_v62 = vadd.f32 %v342_v53, %v3598_v32 }
 0x138   :  { %v344_v56 = vpop.f32.mrf.mxu0 }
 0x139   :  { %812 = vmatprep.mubr.bf16.mxu0 %v404_v54  ;;  %v3636_v60 = vadd.f32 %v344_v56, %v3595_v31 }
 0x13a   :  { %v346_v57 = vpop.f32.mrf.mxu0  ;;  %813 = vmatmul.mubr.bf16.gmra.mxu0 %v403_v55 }
 0x13b   :  { %v3633_v58 = vadd.f32 %v346_v57, %v3598_v32 }
 0x13c   :  { %v348_v59 = vpop.f32.mrf.mxu0 }
 0x13d   :  { %v3639_v61 = vadd.f32 %v348_v59, %v3595_v31  ;;  %v405_v2 = vpack.c.bf16 %v3633_v58, %v3642_v62 }
 0x13e   :  { %v352_v63 = vpop.f32.mrf.mxu0 }
 0x13f   :  { %v406_v1 = vpack.c.bf16 %v3639_v61, %v3636_v60  ;;  %v3658_v10 = vadd.f32 %v352_v63, %v3598_v32 }
 0x140   :  { %v354_v3 = vpop.f32.mrf.mxu0 }
 0x141   :  { %822 = vmatprep.mubr.bf16.mxu0 %v406_v1  ;;  %v3652_v7 = vadd.f32 %v354_v3, %v3595_v31 }
 0x142   :  { %v356_v4 = vpop.f32.mrf.mxu0  ;;  %823 = vmatmul.mubr.bf16.gmra.mxu0 %v405_v2 }
 0x143   :  { %v3649_v5 = vadd.f32 %v356_v4, %v3598_v32 }
 0x144   :  { %v358_v6 = vpop.f32.mrf.mxu0 }
 0x145   :  { %v3655_v8 = vadd.f32 %v358_v6, %v3595_v31  ;;  %v407_v13 = vpack.c.bf16 %v3649_v5, %v3658_v10 }
 0x146   :  { %v362_v11 = vpop.f32.mrf.mxu0 }
 0x147   :  { %v408_v12 = vpack.c.bf16 %v3655_v8, %v3652_v7  ;;  %v3674_v21 = vadd.f32 %v362_v11, %v3598_v32 }
 0x148   :  { %v364_v14 = vpop.f32.mrf.mxu0 }
 0x149   :  { %832 = vmatprep.mubr.bf16.mxu0 %v408_v12  ;;  %v3668_v19 = vadd.f32 %v364_v14, %v3595_v31 }
 0x14a   :  { %v366_v16 = vpop.f32.mrf.mxu0  ;;  %833 = vmatmul.mubr.bf16.gmra.mxu0 %v407_v13 }
 0x14b   :  { %v3665_v17 = vadd.f32 %v366_v16, %v3598_v32 }
 0x14c   :  { %v368_v18 = vpop.f32.mrf.mxu0 }
 0x14d   :  { %v3671_v20 = vadd.f32 %v368_v18, %v3595_v31  ;;  %v409_v27 = vpack.c.bf16 %v3665_v17, %v3674_v21 }
 0x14e   :  { %v372_v23 = vpop.f32.mrf.mxu0 }
 0x14f   :  { %v410_v24 = vpack.c.bf16 %v3671_v20, %v3668_v19  ;;  %v3690_v43 = vadd.f32 %v372_v23, %v3598_v32 }
 0x150   :  { %v374_v28 = vpop.f32.mrf.mxu0 }
 0x151   :  { %842 = vmatprep.mubr.bf16.mxu0 %v410_v24  ;;  %v3684_v40 = vadd.f32 %v374_v28, %v3595_v31  ;;  %4217 = vst [vmem:[#allocation21_spill] sm:$0xff] %v3690_v43  ;;  %v3042_v24 = vld [vmem:[#allocation7 + $0xa4] ss:$8 sps:$4 sm:$0xff]   ;;  %v3045_v28 = vld [vmem:[#allocation7 + $0x94] ss:$8 sps:$4 sm:$0xff]  }
 0x152   :  { %v376_v29 = vpop.f32.mrf.mxu0  ;;  %843 = vmatmul.mubr.bf16.gmra.mxu0 %v409_v27  ;;  %v3040_v27 = vld [vmem:[#allocation7 + $0xa0] ss:$8 sps:$4 sm:$0xff]   ;;  %1205 = vmatprep.subr.bf16.mxu1 %v3042_v24 }
 0x153   :  { %v3681_v33 = vadd.f32 %v376_v29, %v3598_v32  ;;  %1206 = vmatpush2.bf16.msra.mxu1 %v3040_v27  ;;  %v3046_v29 = vld [vmem:[#allocation7 + $0x80] ss:$8 sps:$4 sm:$0xff]  }
 0x154   :  { %v378_v35 = vpop.f32.mrf.mxu0  ;;  %1207 = vmatprep.subr.bf16.mxu1 %v3045_v28 }
 0x155   :  { %v3687_v42 = vadd.f32 %v378_v35, %v3595_v31  ;;  %v411_v48 = vpack.c.bf16 %v3681_v33, %v3690_v43  ;;  %v531_v35 = vpop.f32.mrf.mxu1  ;;  %v3057_v43 = vld [vmem:[#allocation8 + $0x64] ss:$8 sps:$4 sm:$0xff]  }
 0x156   :  { %v382_v44 = vpop.f32.mrf.mxu0 }
 0x157   :  { %4216 = vst [vmem:[#allocation20_spill] sm:$0xff] %v3687_v42  ;;  %v412_v45 = vpack.c.bf16 %v3687_v42, %v3684_v40  ;;  %v3706_v63 = vadd.f32 %v382_v44, %v3598_v32  ;;  %v533_v44 = vpop.f32.mrf.mxu1 }
 0x158   :  { %v384_v53 = vpop.f32.mrf.mxu0 }
 0x159   :  { %852 = vmatprep.mubr.bf16.mxu0 %v412_v45  ;;  %v3700_v57 = vadd.f32 %v384_v53, %v3595_v31  ;;  %4221 = vst [vmem:[#allocation25_spill] sm:$0xff] %v3706_v63  ;;  %v3049_v45 = vld [vmem:[#allocation10 + $0x30] ss:$8 sps:$4 sm:$0xff]   ;;  %v3054_v53 = vld [vmem:[#allocation8 + $0x74] ss:$8 sps:$4 sm:$0xff]  }
 0x15a   :  { %v386_v54 = vpop.f32.mrf.mxu0  ;;  %853 = vmatmul.mubr.bf16.gmra.mxu0 %v411_v48  ;;  %v3051_v48 = vld [vmem:[#allocation10 + $0x34] ss:$8 sps:$4 sm:$0xff]  }
 0x15b   :  { %v3697_v55 = vadd.f32 %v386_v54, %v3598_v32  ;;  %4219 = vst [vmem:[#allocation23_spill] sm:$0xff] %v3700_v57  ;;  %v535_v54 = vpop.f32.mrf.mxu1  ;;  %1460 = vmatprep.subr.bf16.mxu0 %v3051_v48 }
 0x15c   :  { %v388_v56 = vpop.f32.mrf.mxu0  ;;  %1461 = vmatpush1.bf16.msra.mxu0 %v3049_v45 }
 0x15d   :  { %4218 = vst [vmem:[#allocation22_spill] sm:$0xff] %v3697_v55  ;;  %v3703_v59 = vadd.f32 %v388_v56, %v3595_v31  ;;  %v413_v3 = vpack.c.bf16 %v3697_v55, %v3706_v63  ;;  %v3064_v56 = vld [vmem:[#allocation10 + $0x20] ss:$8 sps:$4 sm:$0xff]  }
 0x15e   :  { %v392_v1 = vpop.f32.mrf.mxu0 }
 0x15f   :  { %4220 = vst [vmem:[#allocation24_spill] sm:$0xff] %v3703_v59  ;;  %v414_v2 = vpack.c.bf16 %v3703_v59, %v3700_v57  ;;  %v3722_v16 = vadd.f32 %v392_v1, %v3598_v32  ;;  %v3066_v1 = vld [vmem:[#allocation10 + $0x24] ss:$8 sps:$4 sm:$0xff]   ;;  %v4226_v59 = vmov 0   ;;  %v3052_v57 = vld [vmem:[#allocation8 + $0x70] ss:$8 sps:$4 sm:$0xff]  }
 0x160   :  { %v394_v4 = vpop.f32.mrf.mxu0  ;;  %1462 = vmatprep.subr.bf16.mxu0 %v3066_v1 }
 0x161   :  { %862 = vmatprep.mubr.bf16.mxu0 %v414_v2  ;;  %v3716_v13 = vadd.f32 %v394_v4, %v3595_v31  ;;  %4225 = vst [vmem:[#allocation29_spill] sm:$0xff] %v3722_v16  ;;  %v537_v2 = vpop.f32.mrf.mxu1  ;;  %1463 = vmatpush1.bf16.msra.mxu0 %v3064_v56  ;;  %v3081_v4 = vld [vmem:[#allocation10 + $0x14] ss:$8 sps:$4 sm:$0xff]  }
 0x162   :  { %v396_v6 = vpop.f32.mrf.mxu0  ;;  %863 = vmatmul.mubr.bf16.gmra.mxu0 %v413_v3  ;;  %v3079_v3 = vld [vmem:[#allocation10 + $0x10] ss:$8 sps:$4 sm:$0xff]   ;;  %1464 = vmatprep.subr.bf16.mxu0 %v3081_v4 }
 0x163   :  { %v3713_v11 = vadd.f32 %v396_v6, %v3598_v32  ;;  %4223 = vst [vmem:[#allocation27_spill] sm:$0xff] %v3716_v13  ;;  %v3048_v32 = vld [vmem:[#allocation7 + $0x84] ss:$8 sps:$4 sm:$0xff]   ;;  %v541_v6 = vpop.f32.mrf.mxu1 }
 0x164   :  { %v398_v12 = vpop.f32.mrf.mxu0 }
 0x165   :  { %4222 = vst [vmem:[#allocation26_spill] sm:$0xff] %v3713_v11  ;;  %v3719_v14 = vadd.f32 %v398_v12, %v3595_v31  ;;  %v415_v23 = vpack.c.bf16 %v3713_v11, %v3722_v16  ;;  %v3043_v31 = vld [vmem:[#allocation7 + $0x90] ss:$8 sps:$4 sm:$0xff]   ;;  %v3096_v12 = vld [vmem:[#allocation10 + $0x4] ss:$8 sps:$4 sm:$0xff]   ;;  %1465 = vmatpush1.bf16.msra.mxu0 %v3079_v3 }
 0x166   :  { %1208 = vmatpush2.bf16.msra.mxu1 %v3043_v31  ;;  %1466 = vmatprep.subr.bf16.mxu0 %v3096_v12 }
 0x167   :  { %4224 = vst [vmem:[#allocation28_spill] sm:$0xff] %v3719_v14  ;;  %v416_v18 = vpack.c.bf16 %v3719_v14, %v3716_v13  ;;  %1209 = vmatprep.subr.bf16.mxu1 %v3048_v32 }
 0x169   :  { %872 = vmatprep.mubr.bf16.mxu0 %v416_v18  ;;  %v3094_v18 = vld [vmem:[#allocation10] ss:$8 sps:$4 sm:$0xff]  }
 0x16a   :  { %873 = vmatmul.mubr.bf16.gmra.mxu0 %v415_v23  ;;  %1210 = vmatpush2.bf16.msra.mxu1 %v3046_v29  ;;  %v543_v23 = vpop.f32.mrf.mxu1 }
 0x16b   :  { %1484 = vmatprep.mubr.bf16.mxu0 %v4202_v0  ;;  %1725 = vmatprep.subr.bf16.mxu1 %v3054_v53  ;;  %v883_v53 = vld [vmem:[%s4186_s5] sm:$0x3] }
 0x16c   :  { %1467 = vmatpush1.bf16.msra.mxu0 %v3094_v18  ;;  %v545_v24 = vpop.f32.mrf.mxu1  ;;  %v3768_v3 = vrot.slane %v883_v53, %v3587_v25  ;;  %v3772_v4 = vrot.slane %v883_v53, %v3589_v26 }
 0x16e   :  { %v547_v27 = vpop.f32.mrf.mxu1 }
 0x170   :  { %v3732_v28 = vpop.f32.mrf.mxu1 }
 0x172   :  { %2739 = vmatmul.mubr.msk.bf16.vlgmr.msra.gmra.mxu0 %vm263_vm0, %v3504_v9  ;;  %v3737_v31 = vpop.f32.mrf.mxu1 }
 0x173   :  { %1494 = vmatprep.mubr.bf16.mxu0 %v4202_v0 }
 0x174   :  { %v3739_v32 = vpop.f32.mrf.mxu1 }
 0x176   :  { %v3744_v9 = vpop.f32.mrf.mxu1 }
 0x178   :  { %v3746_v29 = vpop.f32.mrf.mxu1 }
 0x17a   :  { %2740 = vmatmul.mubr.msk.bf16.gmra.mxu0 %vm263_vm0, %v3512_v15  ;;  %v3751_v15 = vpop.f32.mrf.mxu1 }
 0x17b   :  { %1504 = vmatprep.mubr.bf16.mxu0 %v4202_v0 }
 0x17c   :  { %v3753_v45 = vpop.f32.mrf.mxu1 }
 0x182   :  { %2741 = vmatmul.mubr.msk.bf16.gmra.mxu0 %vm263_vm0, %v3520_v22  ;;  %v3758_v22 = vpop.f32.mrf.mxu1 }
 0x183   :  { %1514 = vmatprep.mubr.bf16.mxu0 %v4202_v0 }
 0x18a   :  { %2742 = vmatmul.mubr.msk.bf16.gmra.mxu0 %vm263_vm0, %v3528_v30  ;;  %v3763_v30 = vpop.f32.mrf.mxu1 }
 0x18b   :  { %1524 = vmatprep.mubr.bf16.mxu0 %v4202_v0 }
 0x18c   :  { %v3774_v14 = vpop.f32.mrf.mxu1 }
 0x192   :  { %2743 = vmatmul.mubr.msk.bf16.gmra.mxu0 %vm263_vm0, %v3536_v36 }
 0x193   :  { %1534 = vmatprep.mubr.bf16.mxu0 %v4202_v0 }
 0x19a   :  { %2744 = vmatmul.mubr.msk.bf16.gmra.mxu0 %vm263_vm0, %v3544_v41 }
 0x19b   :  { %1544 = vmatprep.mubr.bf16.mxu0 %v4202_v0 }
 0x1a2   :  { %2745 = vmatmul.mubr.msk.bf16.gmra.mxu0 %vm263_vm0, %v3552_v46 }
 0x1a3   :  { %1554 = vmatprep.mubr.bf16.mxu0 %v4226_v59 }
 0x1aa   :  { %2746 = vmatmul.mubr.msk.bf16.gmra.mxu0 %vm263_vm0, %v3560_v50 }
 0x1f2   :  { %v804_v48 = vpop.f32.mrf.mxu0 }
 0x1f3   :  { %v805_v36 = vadd.f32 %v804_v48, %v531_v35  ;;  %v3780_v48 = vpop.f32.mrf.mxu1 }
 0x1f4   :  { %v806_v56 = vpop.f32.mrf.mxu0 }
 0x1f5   :  { %v807_v1 = vadd.f32 %v806_v56, %v533_v44  ;;  %v895_v44 = vadd.f32 %v3772_v4, %v805_v36 }
 0x1f6   :  { %v808_v12 = vpop.f32.mrf.mxu0 }
 0x1f7   :  { %v809_v18 = vadd.f32 %v808_v12, %v535_v54  ;;  %v896_v13 = vadd.f32 %v3768_v3, %v807_v1  ;;  %v927_v1 = vmax.f32 %v895_v44, 0.0 }
 0x1f8   :  { %v810_v16 = vpop.f32.mrf.mxu0 }
 0x1f9   :  { %v897_v11 = vadd.f32 %v3772_v4, %v809_v18  ;;  %v811_v41 = vadd.f32 %v810_v16, %v537_v2  ;;  %v928_v54 = vmax.f32 %v896_v13, 0.0 }
 0x1fa   :  { %v814_v56 = vpop.f32.mrf.mxu0 }
 0x1fb   :  { %v898_v63 = vadd.f32 %v3768_v3, %v811_v41  ;;  %v929_v0 = vmax.f32 %v897_v11, 0.0  ;;  %v815_v18 = vadd.f32 %v814_v56, %v541_v6  ;;  %v3785_v11 = vpop.f32.mrf.mxu1  ;;  %v3060_v56 = vld [vmem:[#allocation8 + $0x54] ss:$8 sps:$4 sm:$0xff]  }
 0x1fc   :  { %v816_v35 = vpop.f32.mrf.mxu0 }
 0x1fd   :  { %v930_v53 = vmax.f32 %v898_v63, 0.0  ;;  %v817_v12 = vadd.f32 %v816_v35, %v543_v23  ;;  %v959_v55 = vpack.c.bf16 %v929_v0, %v927_v1  ;;  %v899_v63 = vadd.f32 %v3772_v4, %v815_v18  ;;  %v3055_v23 = vld [vmem:[#allocation8 + $0x60] ss:$8 sps:$4 sm:$0xff]   ;;  %v3791_v44 = vpop.f32.mrf.mxu1  ;;  %v3058_v18 = vld [vmem:[#allocation8 + $0x50] ss:$8 sps:$4 sm:$0xff]  }
 0x1fe   :  { %v818_v16 = vpop.f32.mrf.mxu0 }
 0x1ff   :  { %v819_v2 = vadd.f32 %v818_v16, %v545_v24  ;;  %v960_v36 = vpack.c.bf16 %v930_v53, %v928_v54  ;;  %v900_v42 = vadd.f32 %v3768_v3, %v817_v12  ;;  %v931_v53 = vmax.f32 %v899_v63, 0.0 }
 0x200   :  { %v820_v41 = vpop.f32.mrf.mxu0 }
 0x201   :  { %v901_v46 = vadd.f32 %v3772_v4, %v819_v2  ;;  %v821_v13 = vadd.f32 %v820_v41, %v547_v27  ;;  %1211 = vmatprep.mubr.bf16.mxu1 %v960_v36  ;;  %v932_v35 = vmax.f32 %v900_v42, 0.0  ;;  %v3063_v36 = vld [vmem:[#allocation8 + $0x44] ss:$8 sps:$4 sm:$0xff]  }
 0x202   :  { %v824_v59 = vpop.f32.mrf.mxu0  ;;  %1212 = vmatmul.mubr.bf16.vlgmr.msra.gmra.mxu1 %v959_v55 }
 0x203   :  { %v902_v6 = vadd.f32 %v3768_v3, %v821_v13  ;;  %1726 = vmatpush1.bf16.msra.mxu1 %v3052_v57  ;;  %v933_v24 = vmax.f32 %v901_v46, 0.0  ;;  %v825_v55 = vadd.f32 %v824_v59, %v3732_v28  ;;  %v3061_v46 = vld [vmem:[#allocation8 + $0x40] ss:$8 sps:$4 sm:$0xff]  }
 0x204   :  { %v826_v0 = vpop.f32.mrf.mxu0  ;;  %1727 = vmatprep.subr.bf16.mxu1 %v3057_v43  ;;  %v3798_v43 = vpop.f32.mrf.mxu1 }
 0x205   :  { %v934_v27 = vmax.f32 %v902_v6, 0.0  ;;  %v827_v54 = vadd.f32 %v826_v0, %v3737_v31  ;;  %v961_v2 = vpack.c.bf16 %v933_v24, %v931_v53  ;;  %v903_v28 = vadd.f32 %v3772_v4, %v825_v55  ;;  %v3069_v6 = vld [vmem:[#allocation8 + $0x34] ss:$8 sps:$4 sm:$0xff]   ;;  %v3067_v53 = vld [vmem:[#allocation8 + $0x30] ss:$8 sps:$4 sm:$0xff]  }
 0x206   :  { %v828_v12 = vpop.f32.mrf.mxu0  ;;  %v3805_v59 = vpop.f32.mrf.mxu1 }
 0x207   :  { %v829_v57 = vadd.f32 %v828_v12, %v3739_v32  ;;  %v962_v1 = vpack.c.bf16 %v934_v27, %v932_v35  ;;  %1728 = vmatpush1.bf16.msra.mxu1 %v3055_v23  ;;  %v904_v50 = vadd.f32 %v3768_v3, %v827_v54 }
 0x208   :  { %v830_v16 = vpop.f32.mrf.mxu0  ;;  %1729 = vmatprep.subr.bf16.mxu1 %v3060_v56 }
 0x209   :  { %v905_v42 = vadd.f32 %v3772_v4, %v829_v57  ;;  %v831_v31 = vadd.f32 %v830_v16, %v3744_v9  ;;  %1221 = vmatprep.mubr.bf16.mxu1 %v962_v1  ;;  %v936_v23 = vmax.f32 %v904_v50, 0.0  ;;  %v935_v9 = vmax.f32 %v903_v28, 0.0  ;;  %v3810_v57 = vpop.f32.mrf.mxu1  ;;  %v3072_v1 = vld [vmem:[#allocation8 + $0x24] ss:$8 sps:$4 sm:$0xff]   ;;  %v3075_v28 = vld [vmem:[#allocation8 + $0x14] ss:$8 sps:$4 sm:$0xff]  }
 0x20a   :  { %v834_v41 = vpop.f32.mrf.mxu0  ;;  %1222 = vmatmul.mubr.bf16.gmra.mxu1 %v961_v2 }
 0x20b   :  { %v906_v32 = vadd.f32 %v3768_v3, %v831_v31  ;;  %1730 = vmatpush1.bf16.msra.mxu1 %v3058_v18  ;;  %v937_v13 = vmax.f32 %v905_v42, 0.0  ;;  %v835_v56 = vadd.f32 %v834_v41, %v3746_v29  ;;  %v3817_v31 = vpop.f32.mrf.mxu1 }
 0x20c   :  { %v836_v63 = vpop.f32.mrf.mxu0  ;;  %1731 = vmatprep.subr.bf16.mxu1 %v3063_v36  ;;  %v3070_v36 = vld [vmem:[#allocation8 + $0x20] ss:$8 sps:$4 sm:$0xff]  }
 0x20d   :  { %v938_v24 = vmax.f32 %v906_v32, 0.0  ;;  %v837_v0 = vadd.f32 %v836_v63, %v3751_v15  ;;  %v963_v12 = vpack.c.bf16 %v937_v13, %v935_v9  ;;  %v907_v29 = vadd.f32 %v3772_v4, %v835_v56  ;;  %v593_v56 = vpop.f32.mrf.mxu1 }
 0x20e   :  { %v838_v35 = vpop.f32.mrf.mxu0 }
 0x20f   :  { %v839_v27 = vadd.f32 %v838_v35, %v3753_v45  ;;  %v964_v54 = vpack.c.bf16 %v938_v24, %v936_v23  ;;  %1732 = vmatpush1.bf16.msra.mxu1 %v3061_v46  ;;  %v908_v18 = vadd.f32 %v3768_v3, %v837_v0  ;;  %v3073_v24 = vld [vmem:[#allocation8 + $0x10] ss:$8 sps:$4 sm:$0xff]   ;;  %v3078_v35 = vld [vmem:[#allocation8 + $0x4] ss:$8 sps:$4 sm:$0xff]  }
 0x210   :  { %v840_v55 = vpop.f32.mrf.mxu0  ;;  %1733 = vmatprep.subr.bf16.mxu1 %v3069_v6 }
 0x211   :  { %v909_v16 = vadd.f32 %v3772_v4, %v839_v27  ;;  %v841_v15 = vadd.f32 %v840_v55, %v3758_v22  ;;  %1231 = vmatprep.mubr.bf16.mxu1 %v964_v54  ;;  %v940_v41 = vmax.f32 %v908_v18, 0.0  ;;  %v939_v22 = vmax.f32 %v907_v29, 0.0  ;;  %v3076_v55 = vld [vmem:[#allocation8] ss:$8 sps:$4 sm:$0xff]   ;;  %v595_v18 = vpop.f32.mrf.mxu1 }
 0x212   :  { %v844_v2 = vpop.f32.mrf.mxu0  ;;  %1232 = vmatmul.mubr.bf16.gmra.mxu1 %v963_v12 }
 0x213   :  { %v910_v45 = vadd.f32 %v3768_v3, %v841_v15  ;;  %1734 = vmatpush1.bf16.msra.mxu1 %v3067_v53  ;;  %v941_v50 = vmax.f32 %v909_v16, 0.0  ;;  %v845_v13 = vadd.f32 %v844_v2, %v3763_v30  ;;  %v3084_v16 = vld [vmem:[#allocation8 + $0xf4] ss:$8 sps:$4 sm:$0xff]  }
 0x214   :  { %v846_v42 = vpop.f32.mrf.mxu0  ;;  %1735 = vmatprep.subr.bf16.mxu1 %v3072_v1 }
 0x215   :  { %v942_v32 = vmax.f32 %v910_v45, 0.0  ;;  %v847_v46 = vadd.f32 %v846_v42, %v3774_v14  ;;  %v965_v9 = vpack.c.bf16 %v941_v50, %v939_v22  ;;  %v911_v30 = vadd.f32 %v3772_v4, %v845_v13  ;;  %v3087_v22 = vld [vmem:[#allocation8 + $0xe4] ss:$8 sps:$4 sm:$0xff]  }
 0x216   :  { %v848_v63 = vpop.f32.mrf.mxu0 }
 0x217   :  { %v849_v6 = vadd.f32 %v848_v63, %v3780_v48  ;;  %v966_v23 = vpack.c.bf16 %v942_v32, %v940_v41  ;;  %1736 = vmatpush1.bf16.msra.mxu1 %v3070_v36  ;;  %v912_v27 = vadd.f32 %v3768_v3, %v847_v46  ;;  %v943_v45 = vmax.f32 %v911_v30, 0.0  ;;  %v597_v32 = vpop.f32.mrf.mxu1 }
 0x218   :  { %v850_v0 = vpop.f32.mrf.mxu0  ;;  %1737 = vmatprep.subr.bf16.mxu1 %v3075_v28  ;;  %v3082_v28 = vld [vmem:[#allocation8 + $0xf0] ss:$8 sps:$4 sm:$0xff]  }
 0x219   :  { %v913_v54 = vadd.f32 %v3772_v4, %v849_v6  ;;  %v851_v14 = vadd.f32 %v850_v0, %v3785_v11  ;;  %1241 = vmatprep.mubr.bf16.mxu1 %v966_v23  ;;  %v944_v15 = vmax.f32 %v912_v27, 0.0  ;;  %v3085_v23 = vld [vmem:[#allocation8 + $0xe0] ss:$8 sps:$4 sm:$0xff]   ;;  %v601_v0 = vpop.f32.mrf.mxu1 }
 0x21a   :  { %v854_v53 = vpop.f32.mrf.mxu0  ;;  %1242 = vmatmul.mubr.bf16.gmra.mxu1 %v965_v9 }
 0x21b   :  { %v914_v48 = vadd.f32 %v3768_v3, %v851_v14  ;;  %1738 = vmatpush1.bf16.msra.mxu1 %v3073_v24  ;;  %v945_v12 = vmax.f32 %v913_v54, 0.0  ;;  %v855_v11 = vadd.f32 %v854_v53, %v3791_v44 }
 0x21c   :  { %v856_v1 = vpop.f32.mrf.mxu0  ;;  %1739 = vmatprep.subr.bf16.mxu1 %v3078_v35  ;;  %v3090_v35 = vld [vmem:[#allocation8 + $0xd4] ss:$8 sps:$4 sm:$0xff]  }
 0x21d   :  { %v946_v29 = vmax.f32 %v914_v48, 0.0  ;;  %v857_v2 = vadd.f32 %v856_v1, %v3798_v43  ;;  %v967_v46 = vpack.c.bf16 %v945_v12, %v943_v45  ;;  %v915_v44 = vadd.f32 %v3772_v4, %v855_v11  ;;  %v3088_v12 = vld [vmem:[#allocation8 + $0xd0] ss:$8 sps:$4 sm:$0xff]   ;;  %v603_v1 = vpop.f32.mrf.mxu1 }
 0x21e   :  { %v858_v36 = vpop.f32.mrf.mxu0 }
 0x21f   :  { %v859_v50 = vadd.f32 %v858_v36, %v3805_v59  ;;  %v968_v42 = vpack.c.bf16 %v946_v29, %v944_v15  ;;  %1740 = vmatpush1.bf16.msra.mxu1 %v3076_v55  ;;  %v916_v13 = vadd.f32 %v3768_v3, %v857_v2  ;;  %v947_v30 = vmax.f32 %v915_v44, 0.0  ;;  %v3093_v29 = vld [vmem:[#allocation8 + $0xc4] ss:$8 sps:$4 sm:$0xff]  }
 0x220   :  { %v860_v41 = vpop.f32.mrf.mxu0  ;;  %1741 = vmatprep.subr.bf16.mxu1 %v3084_v16 }
 0x221   :  { %v917_v63 = vadd.f32 %v3772_v4, %v859_v50  ;;  %v861_v43 = vadd.f32 %v860_v41, %v3810_v57  ;;  %1251 = vmatprep.mubr.bf16.mxu1 %v968_v42  ;;  %v948_v27 = vmax.f32 %v916_v13, 0.0  ;;  %v605_v42 = vpop.f32.mrf.mxu1  ;;  %v3099_v41 = vld [vmem:[#allocation8 + $0xb4] ss:$8 sps:$4 sm:$0xff]  }
 0x222   :  { %v864_v6 = vpop.f32.mrf.mxu0  ;;  %1252 = vmatmul.mubr.bf16.gmra.mxu1 %v967_v46 }
 0x223   :  { %v918_v59 = vadd.f32 %v3768_v3, %v861_v43  ;;  %1742 = vmatpush2.bf16.msra.mxu1 %v3082_v28  ;;  %v949_v24 = vmax.f32 %v917_v63, 0.0  ;;  %v865_v57 = vadd.f32 %v864_v6, %v3817_v31 }
 0x224   :  { %v866_v9 = vpop.f32.mrf.mxu0  ;;  %1743 = vmatprep.subr.bf16.mxu1 %v3087_v22 }
 0x225   :  { %v950_v54 = vmax.f32 %v918_v59, 0.0  ;;  %v867_v14 = vadd.f32 %v866_v9, %v593_v56  ;;  %v969_v15 = vpack.c.bf16 %v949_v24, %v947_v30  ;;  %v919_v56 = vadd.f32 %v3772_v4, %v865_v57  ;;  %v3097_v59 = vld [vmem:[#allocation8 + $0xb0] ss:$8 sps:$4 sm:$0xff]  }
 0x226   :  { %v868_v53 = vpop.f32.mrf.mxu0 }
 0x227   :  { %v869_v48 = vadd.f32 %v868_v53, %v595_v18  ;;  %v970_v55 = vpack.c.bf16 %v950_v54, %v948_v27  ;;  %1744 = vmatpush2.bf16.msra.mxu1 %v3085_v23  ;;  %v920_v2 = vadd.f32 %v3768_v3, %v867_v14  ;;  %v3091_v18 = vld [vmem:[#allocation8 + $0xc0] ss:$8 sps:$4 sm:$0xff]   ;;  %v951_v63 = vmax.f32 %v919_v56, 0.0  ;;  %v607_v23 = vpop.f32.mrf.mxu1 }
 0x228   :  { %v870_v16 = vpop.f32.mrf.mxu0  ;;  %1745 = vmatprep.subr.bf16.mxu1 %v3090_v35  ;;  %v3112_v56 = vld [vmem:[#allocation11 + $0x60] ss:$8 sps:$4 sm:$0xff]  }
 0x229   :  { %v921_v45 = vadd.f32 %v3772_v4, %v869_v48  ;;  %v871_v11 = vadd.f32 %v870_v16, %v597_v32  ;;  %1261 = vmatprep.mubr.bf16.mxu1 %v970_v55  ;;  %v952_v46 = vmax.f32 %v920_v2, 0.0  ;;  %v3100_v16 = vld [vmem:[#allocation8 + $0xa0] ss:$8 sps:$4 sm:$0xff]  }
 0x22a   :  { %v874_v36 = vpop.f32.mrf.mxu0  ;;  %1262 = vmatmul.mubr.bf16.gmra.mxu1 %v969_v15  ;;  %v3105_v15 = vld [vmem:[#allocation8 + $0x94] ss:$8 sps:$4 sm:$0xff]   ;;  %v3106_v2 = vld [vmem:[#allocation8 + $0x80] ss:$8 sps:$4 sm:$0xff]  }
 0x22b   :  { %v922_v31 = vadd.f32 %v3768_v3, %v871_v11  ;;  %1746 = vmatpush2.bf16.msra.mxu1 %v3088_v12  ;;  %v953_v50 = vmax.f32 %v921_v45, 0.0  ;;  %v875_v43 = vadd.f32 %v874_v36, %v601_v0  ;;  %v3111_v45 = vld [vmem:[#allocation11 + $0x74] ss:$8 sps:$4 sm:$0xff]   ;;  %v3114_v11 = vld [vmem:[#allocation11 + $0x64] ss:$8 sps:$4 sm:$0xff]  }
 0x22c   :  { %v876_v28 = vpop.f32.mrf.mxu0  ;;  %1747 = vmatprep.subr.bf16.mxu1 %v3093_v29  ;;  %v3103_v29 = vld [vmem:[#allocation8 + $0x90] ss:$8 sps:$4 sm:$0xff]   ;;  %2134 = vmatprep.subr.bf16.mxu0 %v3111_v45  ;;  %v3117_v36 = vld [vmem:[#allocation11 + $0x54] ss:$8 sps:$4 sm:$0xff]  }
 0x22d   :  { %v954_v22 = vmax.f32 %v922_v31, 0.0  ;;  %v877_v13 = vadd.f32 %v876_v28, %v603_v1  ;;  %v971_v9 = vpack.c.bf16 %v953_v50, %v951_v63  ;;  %v923_v14 = vadd.f32 %v3772_v4, %v875_v43  ;;  %v3102_v1 = vld [vmem:[#allocation8 + $0xa4] ss:$8 sps:$4 sm:$0xff]   ;;  %v3115_v31 = vld [vmem:[#allocation11 + $0x50] ss:$8 sps:$4 sm:$0xff]  }
 0x22e   :  { %v878_v32 = vpop.f32.mrf.mxu0  ;;  %v3118_v50 = vld [vmem:[#allocation11 + $0x40] ss:$8 sps:$4 sm:$0xff]   ;;  %v3121_v28 = vld [vmem:[#allocation11 + $0x30] ss:$8 sps:$4 sm:$0xff]   ;;  %v3132_v63 = vld [vmem:[#allocation11 + $0x4] ss:$8 sps:$4 sm:$0xff]  }
 0x22f   :  { %v879_v44 = vadd.f32 %v878_v32, %v605_v42  ;;  %v972_v6 = vpack.c.bf16 %v954_v22, %v952_v46  ;;  %1748 = vmatpush2.bf16.msra.mxu1 %v3091_v18  ;;  %v924_v35 = vadd.f32 %v3768_v3, %v877_v13  ;;  %v955_v48 = vmax.f32 %v923_v14, 0.0  ;;  %v3120_v18 = vld [vmem:[#allocation11 + $0x44] ss:$8 sps:$4 sm:$0xff]   ;;  %v3123_v42 = vld [vmem:[#allocation11 + $0x34] ss:$8 sps:$4 sm:$0xff]  }
 0x230   :  { %v880_v24 = vpop.f32.mrf.mxu0  ;;  %1749 = vmatprep.subr.bf16.mxu1 %v3099_v41  ;;  %v3126_v41 = vld [vmem:[#allocation11 + $0x24] ss:$8 sps:$4 sm:$0xff]   ;;  %v3124_v46 = vld [vmem:[#allocation11 + $0x20] ss:$8 sps:$4 sm:$0xff]   ;;  %v3129_v22 = vld [vmem:[#allocation11 + $0x14] ss:$8 sps:$4 sm:$0xff]  }
 0x231   :  { %v925_v27 = vadd.f32 %v3772_v4, %v879_v44  ;;  %v881_v54 = vadd.f32 %v880_v24, %v607_v23  ;;  %1271 = vmatprep.mubr.bf16.mxu1 %v972_v6  ;;  %v956_v57 = vmax.f32 %v924_v35, 0.0  ;;  %v3108_v4 = vld [vmem:[#allocation8 + $0x84] ss:$8 sps:$4 sm:$0xff]   ;;  %v3127_v13 = vld [vmem:[#allocation11 + $0x10] ss:$8 sps:$4 sm:$0xff]  }
 0x232   :  { %1272 = vmatmul.mubr.bf16.gmra.mxu1 %v971_v9  ;;  %v3130_v43 = vld [vmem:[#allocation11] ss:$8 sps:$4 sm:$0xff]   ;;  %v3135_v32 = vld [vmem:[#allocation11 + $0xf4] ss:$8 sps:$4 sm:$0xff]   ;;  %v3133_v44 = vld [vmem:[#allocation11 + $0xf0] ss:$8 sps:$4 sm:$0xff]  }
 0x233   :  { %v926_v0 = vadd.f32 %v3768_v3, %v881_v54  ;;  %1750 = vmatpush2.bf16.msra.mxu1 %v3097_v59  ;;  %v957_v30 = vmax.f32 %v925_v27, 0.0  ;;  %v3109_v3 = vld [vmem:[#allocation11 + $0x70] ss:$8 sps:$4 sm:$0xff]   ;;  %v3138_v6 = vld [vmem:[#allocation11 + $0xe4] ss:$8 sps:$4 sm:$0xff]  }
 0x234   :  { %1751 = vmatprep.subr.bf16.mxu1 %v3102_v1  ;;  %2135 = vmatpush1.bf16.msra.mxu0 %v3109_v3  ;;  %v3136_v59 = vld [vmem:[#allocation11 + $0xe0] ss:$8 sps:$4 sm:$0xff]   ;;  %v3141_v23 = vld [vmem:[#allocation11 + $0xd4] ss:$8 sps:$4 sm:$0xff]   ;;  %v3139_v24 = vld [vmem:[#allocation11 + $0xd0] ss:$8 sps:$4 sm:$0xff]  }
 0x235   :  { %v958_v53 = vmax.f32 %v926_v0, 0.0  ;;  %v973_v12 = vpack.c.bf16 %v957_v30, %v955_v48  ;;  %2136 = vmatprep.subr.bf16.mxu0 %v3114_v11  ;;  %v3144_v9 = vld [vmem:[#allocation11 + $0xc4] ss:$8 sps:$4 sm:$0xff]   ;;  %v3142_v35 = vld [vmem:[#allocation11 + $0xc0] ss:$8 sps:$4 sm:$0xff]  }
 0x236   :  { %v3147_v27 = vld [vmem:[#allocation11 + $0xb4] ss:$8 sps:$4 sm:$0xff]   ;;  %v3145_v54 = vld [vmem:[#allocation11 + $0xb0] ss:$8 sps:$4 sm:$0xff]   ;;  %v1007_v14 = vld [vmem:[%s4188_s7] sm:$0x3] }
 0x237   :  { %v974_v55 = vpack.c.bf16 %v958_v53, %v956_v57  ;;  %1752 = vmatpush2.bf16.msra.mxu1 %v3100_v16  ;;  %v3848_v0 = vrot.slane %v1007_v14, %v3587_v25  ;;  %v3851_v30 = vrot.slane %v1007_v14, %v3589_v26 }
 0x238   :  { %1753 = vmatprep.subr.bf16.mxu1 %v3105_v15  ;;  %2137 = vmatpush1.bf16.msra.mxu0 %v3112_v56 }
 0x239   :  { %1281 = vmatprep.mubr.bf16.mxu1 %v974_v55  ;;  %2138 = vmatprep.subr.bf16.mxu0 %v3117_v36 }
 0x23a   :  { %1282 = vmatmul.mubr.bf16.gmra.mxu1 %v973_v12 }
 0x23b   :  { %1754 = vmatpush2.bf16.msra.mxu1 %v3103_v29 }
 0x23c   :  { %1755 = vmatprep.subr.bf16.mxu1 %v3108_v4  ;;  %2139 = vmatpush1.bf16.msra.mxu0 %v3115_v31 }
 0x23d   :  { %2140 = vmatprep.subr.bf16.mxu0 %v3120_v18 }
 0x23f   :  { %1756 = vmatpush2.bf16.msra.mxu1 %v3106_v2 }
 0x240   :  { %2141 = vmatpush1.bf16.msra.mxu0 %v3118_v50 }
 0x241   :  { %2142 = vmatprep.subr.bf16.mxu0 %v3123_v42 }
 0x244   :  { %2143 = vmatpush1.bf16.msra.mxu0 %v3121_v28 }
 0x245   :  { %2144 = vmatprep.subr.bf16.mxu0 %v3126_v41 }
 0x248   :  { %2145 = vmatpush1.bf16.msra.mxu0 %v3124_v46 }
 0x249   :  { %2146 = vmatprep.subr.bf16.mxu0 %v3129_v22 }
 0x24c   :  { %2147 = vmatpush1.bf16.msra.mxu0 %v3127_v13 }
 0x24d   :  { %2148 = vmatprep.subr.bf16.mxu0 %v3132_v63 }
 0x250   :  { %2149 = vmatpush1.bf16.msra.mxu0 %v3130_v43 }
 0x251   :  { %2150 = vmatprep.subr.bf16.mxu0 %v3135_v32 }
 0x254   :  { %2151 = vmatpush2.bf16.msra.mxu0 %v3133_v44 }
 0x255   :  { %2152 = vmatprep.subr.bf16.mxu0 %v3138_v6 }
 0x258   :  { %2153 = vmatpush2.bf16.msra.mxu0 %v3136_v59 }
 0x259   :  { %2154 = vmatprep.subr.bf16.mxu0 %v3141_v23 }
 0x25c   :  { %2155 = vmatpush2.bf16.msra.mxu0 %v3139_v24 }
 0x25d   :  { %2156 = vmatprep.subr.bf16.mxu0 %v3144_v9 }
 0x260   :  { %2157 = vmatpush2.bf16.msra.mxu0 %v3142_v35 }
 0x261   :  { %2158 = vmatprep.subr.bf16.mxu0 %v3147_v27 }
 0x264   :  { %2159 = vmatpush2.bf16.msra.mxu0 %v3145_v54 }
 0x2c2   :  { %v1213_v57 = vpop.f32.mrf.mxu1 }
 0x2c3   :  { %v1214_v55 = vadd.f32 %v1213_v57, %v3851_v30 }
 0x2c4   :  { %v1215_v53 = vpop.f32.mrf.mxu1 }
 0x2c5   :  { %v1216_v48 = vadd.f32 %v1215_v53, %v3848_v0  ;;  %v1292_v2 = vmax.f32 %v1214_v55, 0.0 }
 0x2c6   :  { %v1217_v12 = vpop.f32.mrf.mxu1 }
 0x2c7   :  { %v1218_v1 = vadd.f32 %v1217_v12, %v3851_v30  ;;  %v1293_v15 = vmax.f32 %v1216_v48, 0.0  ;;  %v3868_v50 = vadd.f32 %v1292_v2, %v3610_v39 }
 0x2c8   :  { %v1219_v16 = vpop.f32.mrf.mxu1 }
 0x2c9   :  { %v1294_v29 = vmax.f32 %v1218_v1, 0.0  ;;  %v1220_v4 = vadd.f32 %v1219_v16, %v3848_v0  ;;  %v3861_v36 = vadd.f32 %v1293_v15, %v3604_v37 }
 0x2ca   :  { %v1223_v3 = vpop.f32.mrf.mxu1 }
 0x2cb   :  { %v1295_v45 = vmax.f32 %v1220_v4, 0.0  ;;  %v3858_v11 = vadd.f32 %v1294_v29, %v3601_v34  ;;  %v1224_v42 = vadd.f32 %v1223_v3, %v3851_v30 }
 0x2cc   :  { %v1225_v56 = vpop.f32.mrf.mxu1 }
 0x2cd   :  { %v3864_v31 = vadd.f32 %v1295_v45, %v3607_v38  ;;  %v1226_v18 = vadd.f32 %v1225_v56, %v3848_v0  ;;  %v1356_v37 = vpack.c.bf16 %v3858_v11, %v3868_v50  ;;  %v1296_v63 = vmax.f32 %v1224_v42, 0.0 }
 0x2ce   :  { %v1227_v28 = vpop.f32.mrf.mxu1 }
 0x2cf   :  { %v1228_v41 = vadd.f32 %v1227_v28, %v3851_v30  ;;  %v1357_v34 = vpack.c.bf16 %v3864_v31, %v3861_v36  ;;  %v1297_v22 = vmax.f32 %v1226_v18, 0.0  ;;  %v3888_v24 = vadd.f32 %v1296_v63, %v3626_v52 }
 0x2d0   :  { %v1229_v46 = vpop.f32.mrf.mxu1 }
 0x2d1   :  { %v1298_v38 = vmax.f32 %v1228_v41, 0.0  ;;  %v1230_v13 = vadd.f32 %v1229_v46, %v3848_v0  ;;  %1757 = vmatprep.mubr.bf16.mxu1 %v1357_v34  ;;  %v3881_v6 = vadd.f32 %v1297_v22, %v3620_v49 }
 0x2d2   :  { %v1233_v39 = vpop.f32.mrf.mxu1  ;;  %1758 = vmatmul.mubr.bf16.vlgmr.msra.gmra.mxu1 %v1356_v37 }
 0x2d3   :  { %v1299_v43 = vmax.f32 %v1230_v13, 0.0  ;;  %v3878_v32 = vadd.f32 %v1298_v38, %v3617_v47  ;;  %v1234_v9 = vadd.f32 %v1233_v39, %v3851_v30 }
 0x2d4   :  { %v1235_v44 = vpop.f32.mrf.mxu1 }
 0x2d5   :  { %v3884_v59 = vadd.f32 %v1299_v43, %v3623_v51  ;;  %v1236_v23 = vadd.f32 %v1235_v44, %v3848_v0  ;;  %v1358_v49 = vpack.c.bf16 %v3878_v32, %v3888_v24  ;;  %v1300_v53 = vmax.f32 %v1234_v9, 0.0 }
 0x2d6   :  { %v1237_v35 = vpop.f32.mrf.mxu1 }
 0x2d7   :  { %v1238_v27 = vadd.f32 %v1237_v35, %v3851_v30  ;;  %v1359_v47 = vpack.c.bf16 %v3884_v59, %v3881_v6  ;;  %v1301_v14 = vmax.f32 %v1236_v23, 0.0  ;;  %v3908_v29 = vadd.f32 %v1300_v53, %v3642_v62 }
 0x2d8   :  { %v1239_v54 = vpop.f32.mrf.mxu1 }
 0x2d9   :  { %v1302_v51 = vmax.f32 %v1238_v27, 0.0  ;;  %v1240_v57 = vadd.f32 %v1239_v54, %v3848_v0  ;;  %1767 = vmatprep.mubr.bf16.mxu1 %v1359_v47  ;;  %v3901_v1 = vadd.f32 %v1301_v14, %v3636_v60 }
 0x2da   :  { %v1243_v52 = vpop.f32.mrf.mxu1  ;;  %1768 = vmatmul.mubr.bf16.gmra.mxu1 %v1358_v49 }
 0x2db   :  { %v1303_v48 = vmax.f32 %v1240_v57, 0.0  ;;  %v3898_v55 = vadd.f32 %v1302_v51, %v3633_v58  ;;  %v1244_v4 = vadd.f32 %v1243_v52, %v3851_v30 }
 0x2dc   :  { %v1245_v12 = vpop.f32.mrf.mxu1 }
 0x2dd   :  { %v3904_v16 = vadd.f32 %v1303_v48, %v3639_v61  ;;  %v1246_v15 = vadd.f32 %v1245_v12, %v3848_v0  ;;  %v1360_v60 = vpack.c.bf16 %v3898_v55, %v3908_v29  ;;  %v1304_v42 = vmax.f32 %v1244_v4, 0.0 }
 0x2de   :  { %v1247_v2 = vpop.f32.mrf.mxu1 }
 0x2df   :  { %v1248_v3 = vadd.f32 %v1247_v2, %v3851_v30  ;;  %v1361_v58 = vpack.c.bf16 %v3904_v16, %v3901_v1  ;;  %v1305_v56 = vmax.f32 %v1246_v15, 0.0  ;;  %v3928_v38 = vadd.f32 %v1304_v42, %v3658_v10 }
 0x2e0   :  { %v1249_v45 = vpop.f32.mrf.mxu1 }
 0x2e1   :  { %v1306_v61 = vmax.f32 %v1248_v3, 0.0  ;;  %v1250_v18 = vadd.f32 %v1249_v45, %v3848_v0  ;;  %1777 = vmatprep.mubr.bf16.mxu1 %v1361_v58  ;;  %v3921_v37 = vadd.f32 %v1305_v56, %v3652_v7 }
 0x2e2   :  { %v1253_v62 = vpop.f32.mrf.mxu1  ;;  %1778 = vmatmul.mubr.bf16.gmra.mxu1 %v1360_v60  ;;  %v4227_v60 = vld [vmem:[#allocation20_spill] sm:$0xff] }
 0x2e3   :  { %v1307_v28 = vmax.f32 %v1250_v18, 0.0  ;;  %v3918_v41 = vadd.f32 %v1306_v61, %v3649_v5  ;;  %v1254_v13 = vadd.f32 %v1253_v62, %v3851_v30  ;;  %v4228_v18 = vld [vmem:[#allocation21_spill] sm:$0xff] }
 0x2e4   :  { %v1255_v34 = vpop.f32.mrf.mxu1 }
 0x2e5   :  { %v3924_v46 = vadd.f32 %v1307_v28, %v3655_v8  ;;  %v1256_v22 = vadd.f32 %v1255_v34, %v3848_v0  ;;  %v1362_v7 = vpack.c.bf16 %v3918_v41, %v3928_v38  ;;  %v1308_v9 = vmax.f32 %v1254_v13, 0.0 }
 0x2e6   :  { %v1257_v63 = vpop.f32.mrf.mxu1 }
 0x2e7   :  { %v1258_v39 = vadd.f32 %v1257_v63, %v3851_v30  ;;  %v1363_v5 = vpack.c.bf16 %v3924_v46, %v3921_v37  ;;  %v1309_v44 = vmax.f32 %v1256_v22, 0.0  ;;  %v3948_v51 = vadd.f32 %v1308_v9, %v3674_v21  ;;  %v4231_v9 = vld [vmem:[#allocation23_spill] sm:$0xff] }
 0x2e8   :  { %v1259_v43 = vpop.f32.mrf.mxu1 }
 0x2e9   :  { %v1310_v8 = vmax.f32 %v1258_v39, 0.0  ;;  %v1260_v23 = vadd.f32 %v1259_v43, %v3848_v0  ;;  %1787 = vmatprep.mubr.bf16.mxu1 %v1363_v5  ;;  %v3941_v54 = vadd.f32 %v1309_v44, %v3668_v19  ;;  %v4229_v44 = vld [vmem:[#allocation22_spill] sm:$0xff] }
 0x2ea   :  { %v1263_v10 = vpop.f32.mrf.mxu1  ;;  %1788 = vmatmul.mubr.bf16.gmra.mxu1 %v1362_v7 }
 0x2eb   :  { %v1311_v35 = vmax.f32 %v1260_v23, 0.0  ;;  %v3938_v27 = vadd.f32 %v1310_v8, %v3665_v17  ;;  %v1264_v57 = vadd.f32 %v1263_v10, %v3851_v30 }
 0x2ec   :  { %v1265_v47 = vpop.f32.mrf.mxu1 }
 0x2ed   :  { %v3944_v49 = vadd.f32 %v1311_v35, %v3671_v20  ;;  %v1266_v14 = vadd.f32 %v1265_v47, %v3848_v0  ;;  %v1364_v19 = vpack.c.bf16 %v3938_v27, %v3948_v51  ;;  %v1312_v4 = vmax.f32 %v1264_v57, 0.0  ;;  %v4233_v35 = vld [vmem:[#allocation24_spill] sm:$0xff]  ;;  %v4235_v57 = vld [vmem:[#allocation25_spill] sm:$0xff] }
 0x2ee   :  { %v1267_v53 = vpop.f32.mrf.mxu1 }
 0x2ef   :  { %v1268_v52 = vadd.f32 %v1267_v53, %v3851_v30  ;;  %v1365_v17 = vpack.c.bf16 %v3944_v49, %v3941_v54  ;;  %v1313_v12 = vmax.f32 %v1266_v14, 0.0  ;;  %v3968_v42 = vadd.f32 %v1312_v4, %v4228_v18  ;;  %v4239_v18 = vld [vmem:[#allocation27_spill] sm:$0xff] }
 0x2f0   :  { %v1269_v48 = vpop.f32.mrf.mxu1 }
 0x2f1   :  { %v1314_v20 = vmax.f32 %v1268_v52, 0.0  ;;  %v1270_v15 = vadd.f32 %v1269_v48, %v3848_v0  ;;  %1797 = vmatprep.mubr.bf16.mxu1 %v1365_v17  ;;  %v3961_v45 = vadd.f32 %v1313_v12, %v3684_v40 }
 0x2f2   :  { %v1273_v21 = vpop.f32.mrf.mxu1  ;;  %1798 = vmatmul.mubr.bf16.gmra.mxu1 %v1364_v19 }
 0x2f3   :  { %v1315_v2 = vmax.f32 %v1270_v15, 0.0  ;;  %v3958_v3 = vadd.f32 %v1314_v20, %v3681_v33  ;;  %v1274_v62 = vadd.f32 %v1273_v21, %v3851_v30 }
 0x2f4   :  { %v1275_v58 = vpop.f32.mrf.mxu1 }
 0x2f5   :  { %v3964_v56 = vadd.f32 %v1315_v2, %v4227_v60  ;;  %v1276_v61 = vadd.f32 %v1275_v58, %v3848_v0  ;;  %v1366_v40 = vpack.c.bf16 %v3958_v3, %v3968_v42  ;;  %v1316_v5 = vmax.f32 %v1274_v62, 0.0  ;;  %v4237_v60 = vld [vmem:[#allocation26_spill] sm:$0xff]  ;;  %v4241_v62 = vld [vmem:[#allocation28_spill] sm:$0xff] }
 0x2f6   :  { %v1277_v28 = vpop.f32.mrf.mxu1 }
 0x2f7   :  { %v1278_v34 = vadd.f32 %v1277_v28, %v3851_v30  ;;  %v1367_v33 = vpack.c.bf16 %v3964_v56, %v3961_v45  ;;  %v1317_v13 = vmax.f32 %v1276_v61, 0.0  ;;  %v3988_v53 = vadd.f32 %v1316_v5, %v4235_v57  ;;  %v3156_v5 = vld [vmem:[#allocation11 + $0x84] ss:$8 sps:$4 sm:$0xff]   ;;  %v3160_v57 = vld [vmem:[#allocation13 + $0x30] sm:$0xff]  }
 0x2f8   :  { %v1279_v22 = vpop.f32.mrf.mxu1 }
 0x2f9   :  { %v1318_v63 = vmax.f32 %v1278_v34, 0.0  ;;  %v1280_v39 = vadd.f32 %v1279_v22, %v3848_v0  ;;  %1807 = vmatprep.mubr.bf16.mxu1 %v1367_v33  ;;  %v3981_v10 = vadd.f32 %v1317_v13, %v4231_v9  ;;  %4236 = vst [vmem:[#allocation23_spill] sm:$0xff] %v3988_v53  ;;  %v4243_v34 = vld [vmem:[#allocation29_spill] sm:$0xff]  ;;  %v3158_v9 = vld [vmem:[#allocation13 + $0x38] sm:$0xff]  }
 0x2fa   :  { %v1283_v43 = vpop.f32.mrf.mxu1  ;;  %1808 = vmatmul.mubr.bf16.gmra.mxu1 %v1366_v40  ;;  %v3150_v40 = vld [vmem:[#allocation11 + $0xa4] ss:$8 sps:$4 sm:$0xff]   ;;  %v3148_v13 = vld [vmem:[#allocation11 + $0xa0] ss:$8 sps:$4 sm:$0xff]  }
 0x2fb   :  { %v1319_v7 = vmax.f32 %v1280_v39, 0.0  ;;  %v3978_v8 = vadd.f32 %v1318_v63, %v4229_v44  ;;  %4232 = vst [vmem:[#allocation21_spill] sm:$0xff] %v3981_v10  ;;  %v1284_v52 = vadd.f32 %v1283_v43, %v3851_v30  ;;  %2160 = vmatprep.subr.bf16.mxu0 %v3150_v40  ;;  %v3153_v63 = vld [vmem:[#allocation11 + $0x94] ss:$8 sps:$4 sm:$0xff]   ;;  %v3151_v39 = vld [vmem:[#allocation11 + $0x90] ss:$8 sps:$4 sm:$0xff]  }
 0x2fc   :  { %v1285_v23 = vpop.f32.mrf.mxu1  ;;  %2161 = vmatpush2.bf16.msra.mxu0 %v3148_v13  ;;  %v3154_v43 = vld [vmem:[#allocation11 + $0x80] ss:$8 sps:$4 sm:$0xff]  }
 0x2fd   :  { %4230 = vst [vmem:[#allocation20_spill] sm:$0xff] %v3978_v8  ;;  %v3984_v47 = vadd.f32 %v1319_v7, %v4233_v35  ;;  %v1286_v14 = vadd.f32 %v1285_v23, %v3848_v0  ;;  %v1368_v20 = vpack.c.bf16 %v3978_v8, %v3988_v53  ;;  %v1320_v2 = vmax.f32 %v1284_v52, 0.0  ;;  %2162 = vmatprep.subr.bf16.mxu0 %v3153_v63  ;;  %v1486_v7 = vpop.f32.mrf.mxu0  ;;  %v3157_v23 = vld [vmem:[#allocation13 + $0x78] sm:$0xff]   ;;  %v3159_v35 = vld [vmem:[#allocation13 + $0x70] sm:$0xff]   ;;  %v3161_v52 = vld [vmem:[#allocation13 + $0x68] sm:$0xff]  }
 0x2fe   :  { %v1287_v17 = vpop.f32.mrf.mxu1  ;;  %2844 = vmatprep.subr.bf16.mxu1 %v3157_v23  ;;  %v1838_v23 = vld [vmem:[%s4191_s10] sm:$0x3] }
 0x2ff   :  { %4234 = vst [vmem:[#allocation22_spill] sm:$0xff] %v3984_v47  ;;  %v1288_v48 = vadd.f32 %v1287_v17, %v3851_v30  ;;  %v1369_v19 = vpack.c.bf16 %v3984_v47, %v3981_v10  ;;  %v1321_v15 = vmax.f32 %v1286_v14, 0.0  ;;  %v4007_v33 = vadd.f32 %v1320_v2, %v4243_v34  ;;  %v1488_v44 = vpop.f32.mrf.mxu0  ;;  %2845 = vmatpush3.bf16.msra.mxu1 %v3158_v9  ;;  %v3167_v2 = vld [vmem:[#allocation13 + $0x50] sm:$0xff]  }
 0x300   :  { %v1289_v12 = vpop.f32.mrf.mxu1  ;;  %2163 = vmatpush2.bf16.msra.mxu0 %v3151_v39  ;;  %2846 = vmatprep.subr.bf16.mxu1 %v3159_v35 }
 0x301   :  { %v1322_v4 = vmax.f32 %v1288_v48, 0.0  ;;  %v1290_v21 = vadd.f32 %v1289_v12, %v3848_v0  ;;  %1817 = vmatprep.mubr.bf16.mxu1 %v1369_v19  ;;  %v4001_v30 = vadd.f32 %v1321_v15, %v4239_v18  ;;  %4244 = vst [vmem:[#allocation27_spill] sm:$0xff] %v4007_v33  ;;  %2164 = vmatprep.subr.bf16.mxu0 %v3156_v5  ;;  %v1490_v14 = vpop.f32.mrf.mxu0  ;;  %v3162_v48 = vld [vmem:[#allocation13 + $0x28] sm:$0xff]   ;;  %v3163_v19 = vld [vmem:[#allocation13 + $0x60] sm:$0xff]   ;;  %v3165_v15 = vld [vmem:[#allocation13 + $0x58] sm:$0xff]  }
 0x302   :  { %1818 = vmatmul.mubr.bf16.gmra.mxu1 %v1368_v20  ;;  %v3164_v20 = vld [vmem:[#allocation13 + $0x20] sm:$0xff]   ;;  %v3169_v18 = vld [vmem:[#allocation13 + $0x48] sm:$0xff]  }
 0x303   :  { %v1323_v58 = vmax.f32 %v1290_v21, 0.0  ;;  %v3998_v61 = vadd.f32 %v1322_v4, %v4237_v60  ;;  %4240 = vst [vmem:[#allocation25_spill] sm:$0xff] %v4001_v30  ;;  %v1492_v17 = vpop.f32.mrf.mxu0  ;;  %2847 = vmatpush3.bf16.msra.mxu1 %v3160_v57  ;;  %v3166_v21 = vld [vmem:[#allocation13 + $0x18] sm:$0xff]   ;;  %v3168_v60 = vld [vmem:[#allocation13 + $0x10] sm:$0xff]  }
 0x304   :  { %2165 = vmatpush2.bf16.msra.mxu0 %v3154_v43  ;;  %2848 = vmatprep.subr.bf16.mxu1 %v3161_v52  ;;  %v4027_v52 = vrot.slane %v1838_v23, %v3587_v25 }
 0x305   :  { %4238 = vst [vmem:[#allocation24_spill] sm:$0xff] %v3998_v61  ;;  %v4004_v28 = vadd.f32 %v1323_v58, %v4241_v62  ;;  %v1370_v0 = vpack.c.bf16 %v3998_v61, %v4007_v33  ;;  %v1496_v12 = vpop.f32.mrf.mxu0 }
 0x307   :  { %4242 = vst [vmem:[#allocation26_spill] sm:$0xff] %v4004_v28  ;;  %v1371_v22 = vpack.c.bf16 %v4004_v28, %v4001_v30  ;;  %2849 = vmatpush3.bf16.msra.mxu1 %v3162_v48  ;;  %v1498_v4 = vpop.f32.mrf.mxu0 }
 0x308   :  { %2850 = vmatprep.subr.bf16.mxu1 %v3163_v19  ;;  %v4030_v19 = vrot.slane %v1838_v23, %v3589_v26 }
 0x309   :  { %1827 = vmatprep.mubr.bf16.mxu1 %v1371_v22  ;;  %v1500_v58 = vpop.f32.mrf.mxu0 }
 0x30a   :  { %1828 = vmatmul.mubr.bf16.gmra.mxu1 %v1370_v0 }
 0x30b   :  { %2851 = vmatpush3.bf16.msra.mxu1 %v3164_v20  ;;  %v1502_v62 = vpop.f32.mrf.mxu0 }
 0x30c   :  { %2852 = vmatprep.subr.bf16.mxu1 %v3165_v15 }
 0x30d   :  { %v1506_v34 = vpop.f32.mrf.mxu0 }
 0x30f   :  { %2853 = vmatpush3.bf16.msra.mxu1 %v3166_v21  ;;  %v1508_v22 = vpop.f32.mrf.mxu0 }
 0x310   :  { %2854 = vmatprep.subr.bf16.mxu1 %v3167_v2 }
 0x311   :  { %v1510_v0 = vpop.f32.mrf.mxu0 }
 0x313   :  { %2855 = vmatpush3.bf16.msra.mxu1 %v3168_v60  ;;  %v1512_v40 = vpop.f32.mrf.mxu0 }
 0x314   :  { %2856 = vmatprep.subr.bf16.mxu1 %v3169_v18 }
 0x315   :  { %v4013_v13 = vpop.f32.mrf.mxu0 }
 0x317   :  { %v4015_v63 = vpop.f32.mrf.mxu0 }
 0x319   :  { %v4017_v39 = vpop.f32.mrf.mxu0 }
 0x31b   :  { %v4019_v5 = vpop.f32.mrf.mxu0 }
 0x31d   :  { %v4024_v35 = vpop.f32.mrf.mxu0 }
 0x31f   :  { %v4032_v2 = vpop.f32.mrf.mxu0 }
 0x392   :  { %v1759_v43 = vpop.f32.mrf.mxu1 }
 0x393   :  { %v1760_v48 = vadd.f32 %v1759_v43, %v1486_v7  ;;  %v4038_v43 = vpop.f32.mrf.mxu0 }
 0x394   :  { %v1761_v9 = vpop.f32.mrf.mxu1 }
 0x395   :  { %v1762_v57 = vadd.f32 %v1761_v9, %v1488_v44  ;;  %v1850_v28 = vadd.f32 %v4030_v19, %v1760_v48 }
 0x396   :  { %v1763_v20 = vpop.f32.mrf.mxu1 }
 0x397   :  { %v1764_v15 = vadd.f32 %v1763_v20, %v1490_v14  ;;  %v1851_v60 = vadd.f32 %v4027_v52, %v1762_v57  ;;  %v1882_v20 = vmax.f32 %v1850_v28, 0.0 }
 0x398   :  { %v1765_v21 = vpop.f32.mrf.mxu1 }
 0x399   :  { %v1852_v18 = vadd.f32 %v4030_v19, %v1764_v15  ;;  %v1766_v33 = vadd.f32 %v1765_v21, %v1492_v17  ;;  %v1883_v23 = vmax.f32 %v1851_v60, 0.0  ;;  %v4040_v17 = vpop.f32.mrf.mxu0 }
 0x39a   :  { %v1769_v44 = vpop.f32.mrf.mxu1 }
 0x39b   :  { %v1853_v9 = vadd.f32 %v4027_v52, %v1766_v33  ;;  %v1884_v30 = vmax.f32 %v1852_v18, 0.0  ;;  %v1770_v53 = vadd.f32 %v1769_v44, %v1496_v12 }
 0x39c   :  { %v1771_v7 = vpop.f32.mrf.mxu1 }
 0x39d   :  { %v1885_v61 = vmax.f32 %v1853_v9, 0.0  ;;  %v1772_v14 = vadd.f32 %v1771_v7, %v1498_v4  ;;  %v1914_v8 = vpack.c.bf16 %v1884_v30, %v1882_v20  ;;  %v1854_v18 = vadd.f32 %v4030_v19, %v1770_v53 }
 0x39e   :  { %v1773_v47 = vpop.f32.mrf.mxu1 }
 0x39f   :  { %v1774_v10 = vadd.f32 %v1773_v47, %v1500_v58  ;;  %v1915_v57 = vpack.c.bf16 %v1885_v61, %v1883_v23  ;;  %v1855_v48 = vadd.f32 %v4027_v52, %v1772_v14  ;;  %v4046_v47 = vpop.f32.mrf.mxu0  ;;  %v1886_v44 = vmax.f32 %v1854_v18, 0.0 }
 0x3a0   :  { %v1775_v15 = vpop.f32.mrf.mxu1 }
 0x3a1   :  { %v1856_v33 = vadd.f32 %v4030_v19, %v1774_v10  ;;  %v1776_v21 = vadd.f32 %v1775_v15, %v1502_v62  ;;  %2166 = vmatprep.mubr.bf16.mxu0 %v1915_v57  ;;  %v1887_v61 = vmax.f32 %v1855_v48, 0.0  ;;  %v1538_v20 = vpop.f32.mrf.mxu0 }
 0x3a2   :  { %v1779_v60 = vpop.f32.mrf.mxu1  ;;  %2167 = vmatmul.mubr.bf16.vlgmr.msra.gmra.mxu0 %v1914_v8 }
 0x3a3   :  { %v1857_v28 = vadd.f32 %v4027_v52, %v1776_v21  ;;  %v1888_v12 = vmax.f32 %v1856_v33, 0.0  ;;  %v1780_v9 = vadd.f32 %v1779_v60, %v1506_v34  ;;  %v1540_v21 = vpop.f32.mrf.mxu0 }
 0x3a4   :  { %v1781_v4 = vpop.f32.mrf.mxu1 }
 0x3a5   :  { %v1889_v30 = vmax.f32 %v1857_v28, 0.0  ;;  %v1782_v58 = vadd.f32 %v1781_v4, %v1508_v22  ;;  %v1916_v14 = vpack.c.bf16 %v1888_v12, %v1886_v44  ;;  %v1858_v15 = vadd.f32 %v4030_v19, %v1780_v9  ;;  %v1542_v44 = vpop.f32.mrf.mxu0 }
 0x3a6   :  { %v1783_v7 = vpop.f32.mrf.mxu1 }
 0x3a7   :  { %v1784_v23 = vadd.f32 %v1783_v7, %v1510_v0  ;;  %v1917_v10 = vpack.c.bf16 %v1889_v30, %v1887_v61  ;;  %v1859_v53 = vadd.f32 %v4027_v52, %v1782_v58  ;;  %v1890_v28 = vmax.f32 %v1858_v15, 0.0 }
 0x3a8   :  { %v1785_v62 = vpop.f32.mrf.mxu1 }
 0x3a9   :  { %v1860_v8 = vadd.f32 %v4030_v19, %v1784_v23  ;;  %v1786_v57 = vadd.f32 %v1785_v62, %v1512_v40  ;;  %2176 = vmatprep.mubr.bf16.mxu0 %v1917_v10  ;;  %v1891_v0 = vmax.f32 %v1859_v53, 0.0 }
 0x3aa   :  { %v1789_v33 = vpop.f32.mrf.mxu1  ;;  %2177 = vmatmul.mubr.bf16.gmra.mxu0 %v1916_v14 }
 0x3ab   :  { %v1861_v22 = vadd.f32 %v4027_v52, %v1786_v57  ;;  %v1892_v48 = vmax.f32 %v1860_v8, 0.0  ;;  %v1790_v12 = vadd.f32 %v1789_v33, %v4013_v13 }
 0x3ac   :  { %v1791_v34 = vpop.f32.mrf.mxu1 }
 0x3ad   :  { %v1893_v18 = vmax.f32 %v1861_v22, 0.0  ;;  %v1792_v60 = vadd.f32 %v1791_v34, %v4015_v63  ;;  %v1918_v58 = vpack.c.bf16 %v1892_v48, %v1890_v28  ;;  %v1862_v10 = vadd.f32 %v4030_v19, %v1790_v12 }
 0x3ae   :  { %v1793_v4 = vpop.f32.mrf.mxu1 }
 0x3af   :  { %v1794_v40 = vadd.f32 %v1793_v4, %v4017_v39  ;;  %v1919_v61 = vpack.c.bf16 %v1893_v18, %v1891_v0  ;;  %v1863_v9 = vadd.f32 %v4027_v52, %v1792_v60  ;;  %v1546_v39 = vpop.f32.mrf.mxu0  ;;  %v1894_v15 = vmax.f32 %v1862_v10, 0.0 }
 0x3b0   :  { %v1795_v30 = vpop.f32.mrf.mxu1 }
 0x3b1   :  { %v1864_v7 = vadd.f32 %v4030_v19, %v1794_v40  ;;  %v1796_v23 = vadd.f32 %v1795_v30, %v4019_v5  ;;  %2186 = vmatprep.mubr.bf16.mxu0 %v1919_v61  ;;  %v1895_v53 = vmax.f32 %v1863_v9, 0.0  ;;  %v1548_v18 = vpop.f32.mrf.mxu0 }
 0x3b2   :  { %v1799_v63 = vpop.f32.mrf.mxu1  ;;  %2187 = vmatmul.mubr.bf16.gmra.mxu0 %v1918_v58 }
 0x3b3   :  { %v1865_v13 = vadd.f32 %v4027_v52, %v1796_v23  ;;  %v1896_v62 = vmax.f32 %v1864_v7, 0.0  ;;  %v1800_v33 = vadd.f32 %v1799_v63, %v4024_v35 }
 0x3b4   :  { %v1801_v14 = vpop.f32.mrf.mxu1 }
 0x3b5   :  { %v1897_v8 = vmax.f32 %v1865_v13, 0.0  ;;  %v1802_v57 = vadd.f32 %v1801_v14, %v4032_v2  ;;  %v1920_v0 = vpack.c.bf16 %v1896_v62, %v1894_v15  ;;  %v1866_v4 = vadd.f32 %v4030_v19, %v1800_v33 }
 0x3b6   :  { %v1803_v22 = vpop.f32.mrf.mxu1 }
 0x3b7   :  { %v1804_v5 = vadd.f32 %v1803_v22, %v4038_v43  ;;  %v1921_v48 = vpack.c.bf16 %v1897_v8, %v1895_v53  ;;  %v1867_v60 = vadd.f32 %v4027_v52, %v1802_v57  ;;  %v1550_v43 = vpop.f32.mrf.mxu0  ;;  %v1898_v7 = vmax.f32 %v1866_v4, 0.0 }
 0x3b8   :  { %v1805_v34 = vpop.f32.mrf.mxu1 }
 0x3b9   :  { %v1868_v28 = vadd.f32 %v4030_v19, %v1804_v5  ;;  %v1806_v12 = vadd.f32 %v1805_v34, %v4040_v17  ;;  %2196 = vmatprep.mubr.bf16.mxu0 %v1921_v48  ;;  %v1899_v30 = vmax.f32 %v1867_v60, 0.0  ;;  %v1552_v14 = vpop.f32.mrf.mxu0 }
 0x3ba   :  { %v1809_v2 = vpop.f32.mrf.mxu1  ;;  %2197 = vmatmul.mubr.bf16.gmra.mxu0 %v1920_v0 }
 0x3bb   :  { %v1869_v35 = vadd.f32 %v4027_v52, %v1806_v12  ;;  %v1900_v40 = vmax.f32 %v1868_v28, 0.0  ;;  %v1810_v23 = vadd.f32 %v1809_v2, %v4046_v47  ;;  %v1556_v47 = vpop.f32.mrf.mxu0 }
 0x3bc   :  { %v1811_v61 = vpop.f32.mrf.mxu1 }
 0x3bd   :  { %v1901_v58 = vmax.f32 %v1869_v35, 0.0  ;;  %v1812_v9 = vadd.f32 %v1811_v61, %v1538_v20  ;;  %v1922_v17 = vpack.c.bf16 %v1900_v40, %v1898_v7  ;;  %v1870_v15 = vadd.f32 %v4030_v19, %v1810_v23 }
 0x3be   :  { %v1813_v10 = vpop.f32.mrf.mxu1 }
 0x3bf   :  { %v1814_v63 = vadd.f32 %v1813_v10, %v1540_v21  ;;  %v1923_v13 = vpack.c.bf16 %v1901_v58, %v1899_v30  ;;  %v1871_v53 = vadd.f32 %v4027_v52, %v1812_v9  ;;  %v1902_v0 = vmax.f32 %v1870_v15, 0.0 }
 0x3c0   :  { %v1815_v62 = vpop.f32.mrf.mxu1 }
 0x3c1   :  { %v1872_v8 = vadd.f32 %v4030_v19, %v1814_v63  ;;  %v1816_v57 = vadd.f32 %v1815_v62, %v1542_v44  ;;  %2206 = vmatprep.mubr.bf16.mxu0 %v1923_v13  ;;  %v1903_v21 = vmax.f32 %v1871_v53, 0.0  ;;  %v1558_v44 = vpop.f32.mrf.mxu0 }
 0x3c2   :  { %v1819_v33 = vpop.f32.mrf.mxu1  ;;  %2207 = vmatmul.mubr.bf16.gmra.mxu0 %v1922_v17 }
 0x3c3   :  { %v1873_v20 = vadd.f32 %v4027_v52, %v1816_v57  ;;  %v1904_v22 = vmax.f32 %v1872_v8, 0.0  ;;  %v1820_v60 = vadd.f32 %v1819_v33, %v1546_v39  ;;  %v1560_v39 = vpop.f32.mrf.mxu0 }
 0x3c4   :  { %v1821_v5 = vpop.f32.mrf.mxu1 }
 0x3c5   :  { %v1905_v48 = vmax.f32 %v1873_v20, 0.0  ;;  %v1822_v34 = vadd.f32 %v1821_v5, %v1548_v18  ;;  %v1924_v2 = vpack.c.bf16 %v1904_v22, %v1902_v0  ;;  %v1874_v58 = vadd.f32 %v4030_v19, %v1820_v60 }
 0x3c6   :  { %v1823_v28 = vpop.f32.mrf.mxu1 }
 0x3c7   :  { %v1824_v12 = vadd.f32 %v1823_v28, %v1550_v43  ;;  %v1925_v4 = vpack.c.bf16 %v1905_v48, %v1903_v21  ;;  %v1875_v40 = vadd.f32 %v4027_v52, %v1822_v34  ;;  %v1906_v13 = vmax.f32 %v1874_v58, 0.0 }
 0x3c8   :  { %v1825_v35 = vpop.f32.mrf.mxu1 }
 0x3c9   :  { %v1876_v61 = vadd.f32 %v4030_v19, %v1824_v12  ;;  %v1826_v30 = vadd.f32 %v1825_v35, %v1552_v14  ;;  %2216 = vmatprep.mubr.bf16.mxu0 %v1925_v4  ;;  %v1907_v43 = vmax.f32 %v1875_v40, 0.0  ;;  %v1562_v14 = vpop.f32.mrf.mxu0  ;;  %v3170_v12 = vld [vmem:[#allocation13 + $0x8] sm:$0xff]   ;;  %v3171_v4 = vld [vmem:[#allocation13 + $0x40] sm:$0xff]  }
 0x3ca   :  { %v1829_v9 = vpop.f32.mrf.mxu1  ;;  %2217 = vmatmul.mubr.bf16.gmra.mxu0 %v1924_v2  ;;  %2857 = vmatpush3.bf16.msra.mxu1 %v3170_v12  ;;  %v3172_v2 = vld [vmem:[#allocation13] sm:$0xff]  }
 0x3cb   :  { %v1877_v18 = vadd.f32 %v4027_v52, %v1826_v30  ;;  %v1908_v7 = vmax.f32 %v1876_v61, 0.0  ;;  %v1830_v17 = vadd.f32 %v1829_v9, %v1556_v47  ;;  %2858 = vmatprep.subr.bf16.mxu1 %v3171_v4 }
 0x3cc   :  { %v1831_v23 = vpop.f32.mrf.mxu1 }
 0x3cd   :  { %v1909_v10 = vmax.f32 %v1877_v18, 0.0  ;;  %v1832_v63 = vadd.f32 %v1831_v23, %v1558_v44  ;;  %v1926_v57 = vpack.c.bf16 %v1908_v7, %v1906_v13  ;;  %v1878_v5 = vadd.f32 %v4030_v19, %v1830_v17 }
 0x3ce   :  { %v1833_v62 = vpop.f32.mrf.mxu1  ;;  %2859 = vmatpush3.bf16.msra.mxu1 %v3172_v2 }
 0x3cf   :  { %v1834_v53 = vadd.f32 %v1833_v62, %v1560_v39  ;;  %v1927_v8 = vpack.c.bf16 %v1909_v10, %v1907_v43  ;;  %v1879_v33 = vadd.f32 %v4027_v52, %v1832_v63  ;;  %v1910_v0 = vmax.f32 %v1878_v5, 0.0 }
 0x3d0   :  { %v1835_v15 = vpop.f32.mrf.mxu1 }
 0x3d1   :  { %v1880_v20 = vadd.f32 %v4030_v19, %v1834_v53  ;;  %v1836_v22 = vadd.f32 %v1835_v15, %v1562_v14  ;;  %2226 = vmatprep.mubr.bf16.mxu0 %v1927_v8  ;;  %v1911_v34 = vmax.f32 %v1879_v33, 0.0  ;;  %v1962_v19 = vld [vmem:[%s4193_s12] sm:$0x3] }
 0x3d2   :  { %2227 = vmatmul.mubr.bf16.gmra.mxu0 %v1926_v57  ;;  %v4088_v44 = vrot.slane %v1962_v19, %v3589_v26 }
 0x3d3   :  { %v1881_v21 = vadd.f32 %v4027_v52, %v1836_v22  ;;  %v1912_v48 = vmax.f32 %v1880_v20, 0.0  ;;  %v4085_v52 = vrot.slane %v1962_v19, %v3587_v25 }
 0x3d5   :  { %v1913_v47 = vmax.f32 %v1881_v21, 0.0  ;;  %v1928_v28 = vpack.c.bf16 %v1912_v48, %v1910_v0 }
 0x3d7   :  { %v1929_v60 = vpack.c.bf16 %v1913_v47, %v1911_v34 }
 0x3d9   :  { %2236 = vmatprep.mubr.bf16.mxu0 %v1929_v60 }
 0x3da   :  { %2237 = vmatmul.mubr.bf16.gmra.mxu0 %v1928_v28 }
 0x462   :  { %v2168_v35 = vpop.f32.mrf.mxu0 }
 0x463   :  { %v2169_v30 = vadd.f32 %v2168_v35, %v4088_v44 }
 0x464   :  { %v2170_v40 = vpop.f32.mrf.mxu0 }
 0x465   :  { %v2171_v61 = vadd.f32 %v2170_v40, %v4085_v52  ;;  %v2247_v43 = vmax.f32 %v2169_v30, 0.0 }
 0x466   :  { %v2172_v58 = vpop.f32.mrf.mxu0 }
 0x467   :  { %v2173_v9 = vadd.f32 %v2172_v58, %v4088_v44  ;;  %v2248_v7 = vmax.f32 %v2171_v61, 0.0  ;;  %v2279_v53 = vadd.f32 %v2247_v43, %v3868_v50 }
 0x468   :  { %v2174_v18 = vpop.f32.mrf.mxu0 }
 0x469   :  { %v2249_v39 = vmax.f32 %v2173_v9, 0.0  ;;  %v2175_v23 = vadd.f32 %v2174_v18, %v4085_v52  ;;  %v2280_v13 = vadd.f32 %v2248_v7, %v3861_v36 }
 0x46a   :  { %v2178_v25 = vpop.f32.mrf.mxu0 }
 0x46b   :  { %v2250_v10 = vmax.f32 %v2175_v23, 0.0  ;;  %v2281_v26 = vadd.f32 %v2249_v39, %v3858_v11  ;;  %v2179_v8 = vadd.f32 %v2178_v25, %v4088_v44 }
 0x46c   :  { %v2180_v63 = vpop.f32.mrf.mxu0 }
 0x46d   :  { %v2282_v17 = vadd.f32 %v2250_v10, %v3864_v31  ;;  %v2181_v62 = vadd.f32 %v2180_v63, %v4085_v52  ;;  %v2311_v33 = vpack.c.bf16 %v2281_v26, %v2279_v53  ;;  %v2251_v36 = vmax.f32 %v2179_v8, 0.0 }
 0x46e   :  { %v2182_v57 = vpop.f32.mrf.mxu0 }
 0x46f   :  { %v2183_v14 = vadd.f32 %v2182_v57, %v4088_v44  ;;  %v2312_v15 = vpack.c.bf16 %v2282_v17, %v2280_v13  ;;  %v2252_v22 = vmax.f32 %v2181_v62, 0.0  ;;  %v2283_v60 = vadd.f32 %v2251_v36, %v3888_v24 }
 0x470   :  { %v2184_v20 = vpop.f32.mrf.mxu0 }
 0x471   :  { %v2253_v5 = vmax.f32 %v2183_v14, 0.0  ;;  %v2185_v11 = vadd.f32 %v2184_v20, %v4085_v52  ;;  %2494 = vmatprep.mubr.bf16.mxu1 %v2312_v15  ;;  %v2284_v34 = vadd.f32 %v2252_v22, %v3881_v6 }
 0x472   :  { %v2188_v21 = vpop.f32.mrf.mxu0  ;;  %2495 = vmatmul.mubr.bf16.vlgmr.msra.gmra.mxu1 %v2311_v33 }
 0x473   :  { %v2254_v31 = vmax.f32 %v2185_v11, 0.0  ;;  %v2285_v48 = vadd.f32 %v2253_v5, %v3878_v32  ;;  %v2189_v28 = vadd.f32 %v2188_v21, %v4088_v44 }
 0x474   :  { %v2190_v50 = vpop.f32.mrf.mxu0 }
 0x475   :  { %v2286_v47 = vadd.f32 %v2254_v31, %v3884_v59  ;;  %v2191_v0 = vadd.f32 %v2190_v50, %v4085_v52  ;;  %v2313_v35 = vpack.c.bf16 %v2285_v48, %v2283_v60  ;;  %v2255_v6 = vmax.f32 %v2189_v28, 0.0 }
 0x476   :  { %v2192_v12 = vpop.f32.mrf.mxu0 }
 0x477   :  { %v2193_v4 = vadd.f32 %v2192_v12, %v4088_v44  ;;  %v2314_v2 = vpack.c.bf16 %v2286_v47, %v2284_v34  ;;  %v2256_v40 = vmax.f32 %v2191_v0, 0.0  ;;  %v2287_v39 = vadd.f32 %v2255_v6, %v3908_v29 }
 0x478   :  { %v2194_v19 = vpop.f32.mrf.mxu0 }
 0x479   :  { %v2257_v61 = vmax.f32 %v2193_v4, 0.0  ;;  %v2195_v32 = vadd.f32 %v2194_v19, %v4085_v52  ;;  %2502 = vmatprep.mubr.bf16.mxu1 %v2314_v2  ;;  %v2288_v9 = vadd.f32 %v2256_v40, %v3901_v1 }
 0x47a   :  { %v2198_v30 = vpop.f32.mrf.mxu0  ;;  %2503 = vmatmul.mubr.bf16.gmra.mxu1 %v2313_v35 }
 0x47b   :  { %v2258_v59 = vmax.f32 %v2195_v32, 0.0  ;;  %v2289_v58 = vadd.f32 %v2257_v61, %v3898_v55  ;;  %v2199_v23 = vadd.f32 %v2198_v30, %v4088_v44 }
 0x47c   :  { %v2200_v24 = vpop.f32.mrf.mxu0 }
 0x47d   :  { %v2290_v18 = vadd.f32 %v2258_v59, %v3904_v16  ;;  %v2201_v7 = vadd.f32 %v2200_v24, %v4085_v52  ;;  %v2315_v63 = vpack.c.bf16 %v2289_v58, %v2287_v39  ;;  %v2259_v1 = vmax.f32 %v2199_v23, 0.0 }
 0x47e   :  { %v2202_v43 = vpop.f32.mrf.mxu0 }
 0x47f   :  { %v2203_v25 = vadd.f32 %v2202_v43, %v4088_v44  ;;  %v2316_v10 = vpack.c.bf16 %v2290_v18, %v2288_v9  ;;  %v2260_v13 = vmax.f32 %v2201_v7, 0.0  ;;  %v2291_v15 = vadd.f32 %v2259_v1, %v3928_v38  ;;  %v4247_v1 = vld [vmem:[#allocation22_spill] sm:$0xff] }
 0x480   :  { %v2204_v26 = vpop.f32.mrf.mxu0 }
 0x481   :  { %v2261_v17 = vmax.f32 %v2203_v25, 0.0  ;;  %v2205_v55 = vadd.f32 %v2204_v26, %v4085_v52  ;;  %2510 = vmatprep.mubr.bf16.mxu1 %v2316_v10  ;;  %v2292_v8 = vadd.f32 %v2260_v13, %v3921_v37 }
 0x482   :  { %v2208_v62 = vpop.f32.mrf.mxu0  ;;  %2511 = vmatmul.mubr.bf16.gmra.mxu1 %v2315_v63  ;;  %v4245_v63 = vld [vmem:[#allocation20_spill] sm:$0xff] }
 0x483   :  { %v2262_v16 = vmax.f32 %v2205_v55, 0.0  ;;  %v2293_v53 = vadd.f32 %v2261_v17, %v3918_v41  ;;  %v2209_v33 = vadd.f32 %v2208_v62, %v4088_v44  ;;  %v4246_v17 = vld [vmem:[#allocation21_spill] sm:$0xff] }
 0x484   :  { %v2210_v29 = vpop.f32.mrf.mxu0 }
 0x485   :  { %v2294_v57 = vadd.f32 %v2262_v16, %v3924_v46  ;;  %v2211_v14 = vadd.f32 %v2210_v29, %v4085_v52  ;;  %v2317_v36 = vpack.c.bf16 %v2293_v53, %v2291_v15  ;;  %v2263_v37 = vmax.f32 %v2209_v33, 0.0  ;;  %v4248_v53 = vld [vmem:[#allocation23_spill] sm:$0xff] }
 0x486   :  { %v2212_v20 = vpop.f32.mrf.mxu0 }
 0x487   :  { %v2213_v22 = vadd.f32 %v2212_v20, %v4088_v44  ;;  %v2318_v5 = vpack.c.bf16 %v2294_v57, %v2292_v8  ;;  %v2264_v21 = vmax.f32 %v2211_v14, 0.0  ;;  %v2295_v60 = vadd.f32 %v2263_v37, %v3948_v51  ;;  %v4250_v37 = vld [vmem:[#allocation25_spill] sm:$0xff] }
 0x488   :  { %v2214_v11 = vpop.f32.mrf.mxu0 }
 0x489   :  { %v2265_v31 = vmax.f32 %v2213_v22, 0.0  ;;  %v2215_v41 = vadd.f32 %v2214_v11, %v4085_v52  ;;  %2518 = vmatprep.mubr.bf16.mxu1 %v2318_v5  ;;  %v2296_v34 = vadd.f32 %v2264_v21, %v3941_v54 }
 0x48a   :  { %v2218_v48 = vpop.f32.mrf.mxu0  ;;  %2519 = vmatmul.mubr.bf16.gmra.mxu1 %v2317_v36 }
 0x48b   :  { %v2266_v46 = vmax.f32 %v2215_v41, 0.0  ;;  %v2297_v50 = vadd.f32 %v2265_v31, %v3938_v27  ;;  %v2219_v28 = vadd.f32 %v2218_v48, %v4088_v44  ;;  %v4249_v31 = vld [vmem:[#allocation24_spill] sm:$0xff] }
 0x48c   :  { %v2220_v38 = vpop.f32.mrf.mxu0 }
 0x48d   :  { %v2298_v47 = vadd.f32 %v2266_v46, %v3944_v49  ;;  %v2221_v0 = vadd.f32 %v2220_v38, %v4085_v52  ;;  %v2319_v19 = vpack.c.bf16 %v2297_v50, %v2295_v60  ;;  %v2267_v54 = vmax.f32 %v2219_v28, 0.0  ;;  %v4251_v46 = vld [vmem:[#allocation26_spill] sm:$0xff]  ;;  %v4252_v38 = vld [vmem:[#allocation27_spill] sm:$0xff] }
 0x48e   :  { %v2222_v12 = vpop.f32.mrf.mxu0 }
 0x48f   :  { %v2223_v4 = vadd.f32 %v2222_v12, %v4088_v44  ;;  %v2320_v2 = vpack.c.bf16 %v2298_v47, %v2296_v34  ;;  %v2268_v40 = vmax.f32 %v2221_v0, 0.0  ;;  %v2299_v24 = vadd.f32 %v2267_v54, %v3968_v42 }
 0x490   :  { %v2224_v35 = vpop.f32.mrf.mxu0 }
 0x491   :  { %v2269_v61 = vmax.f32 %v2223_v4, 0.0  ;;  %v2225_v27 = vadd.f32 %v2224_v35, %v4085_v52  ;;  %2526 = vmatprep.mubr.bf16.mxu1 %v2320_v2  ;;  %v2300_v30 = vadd.f32 %v2268_v40, %v3961_v45 }
 0x492   :  { %v2228_v32 = vpop.f32.mrf.mxu0  ;;  %2527 = vmatmul.mubr.bf16.gmra.mxu1 %v2319_v19 }
 0x493   :  { %v2270_v49 = vmax.f32 %v2225_v27, 0.0  ;;  %v2301_v6 = vadd.f32 %v2269_v61, %v3958_v3  ;;  %v2229_v9 = vadd.f32 %v2228_v32, %v4088_v44 }
 0x494   :  { %v2230_v51 = vpop.f32.mrf.mxu0 }
 0x495   :  { %v2302_v59 = vadd.f32 %v2270_v49, %v3964_v56  ;;  %v2231_v58 = vadd.f32 %v2230_v51, %v4085_v52  ;;  %v2321_v23 = vpack.c.bf16 %v2301_v6, %v2299_v24  ;;  %v2271_v45 = vmax.f32 %v2229_v9, 0.0 }
 0x496   :  { %v2232_v18 = vpop.f32.mrf.mxu0 }
 0x497   :  { %v2233_v7 = vadd.f32 %v2232_v18, %v4088_v44  ;;  %v2322_v39 = vpack.c.bf16 %v2302_v59, %v2300_v30  ;;  %v2272_v25 = vmax.f32 %v2231_v58, 0.0  ;;  %v2303_v29 = vadd.f32 %v2271_v45, %v4248_v53 }
 0x498   :  { %v2234_v43 = vpop.f32.mrf.mxu0 }
 0x499   :  { %v2273_v10 = vmax.f32 %v2233_v7, 0.0  ;;  %v2235_v3 = vadd.f32 %v2234_v43, %v4085_v52  ;;  %2534 = vmatprep.mubr.bf16.mxu1 %v2322_v39  ;;  %v2304_v55 = vadd.f32 %v2272_v25, %v4246_v17 }
 0x49a   :  { %v2238_v26 = vpop.f32.mrf.mxu0  ;;  %2535 = vmatmul.mubr.bf16.gmra.mxu1 %v2321_v23 }
 0x49b   :  { %v2274_v56 = vmax.f32 %v2235_v3, 0.0  ;;  %v2305_v13 = vadd.f32 %v2273_v10, %v4245_v63  ;;  %v2239_v8 = vadd.f32 %v2238_v26, %v4088_v44 }
 0x49c   :  { %v2240_v42 = vpop.f32.mrf.mxu0 }
 0x49d   :  { %v2306_v62 = vadd.f32 %v2274_v56, %v4247_v1  ;;  %v2241_v16 = vadd.f32 %v2240_v42, %v4085_v52  ;;  %v2323_v33 = vpack.c.bf16 %v2305_v13, %v2303_v29  ;;  %v2275_v36 = vmax.f32 %v2239_v8, 0.0 }
 0x49e   :  { %v2242_v57 = vpop.f32.mrf.mxu0 }
 0x49f   :  { %v2243_v14 = vadd.f32 %v2242_v57, %v4088_v44  ;;  %v2324_v15 = vpack.c.bf16 %v2306_v62, %v2304_v55  ;;  %v2276_v22 = vmax.f32 %v2241_v16, 0.0  ;;  %v2307_v34 = vadd.f32 %v2275_v36, %v4252_v38 }
 0x4a0   :  { %v2244_v20 = vpop.f32.mrf.mxu0 }
 0x4a1   :  { %v2277_v5 = vmax.f32 %v2243_v14, 0.0  ;;  %v2245_v11 = vadd.f32 %v2244_v20, %v4085_v52  ;;  %2542 = vmatprep.mubr.bf16.mxu1 %v2324_v15  ;;  %v2308_v48 = vadd.f32 %v2276_v22, %v4250_v37  ;;  %v4157_v52 = vld [vmem:[%s4195_s14] ss:$0 sm:$0xff]  ;;  %s3355_s14 = smov [#allocation14]  }
 0x4a2   :  { %2543 = vmatmul.mubr.bf16.gmra.mxu1 %v2323_v33  ;;  %s2612_s20 = sshll.u32 %s3355_s14, 4  ;;  %s2613_s20 = int_to_ptr.vmem [resolvable:$true] %s2612_s20 }
 0x4a3   :  { %v2278_v21 = vmax.f32 %v2245_v11, 0.0  ;;  %v2309_v41 = vadd.f32 %v2277_v5, %v4249_v31  ;;  %s3313_s1 = scalar_lea.vmem %s2613_s20, 2048  ;;  %p3318_p8 = scmp.lt.s32.totalorder %s2613_s20, %s2613_s20 }
 0x4a4   :  { %p3314_p7 = scmp.ne.s32.totalorder %s2613_s20, %s3313_s1  ;;  %p3319_p9 = scmp.lt.s32.totalorder %s3313_s1, %s3313_s1 }
 0x4a5   :  { %v2310_v50 = vadd.f32 %v2278_v21, %v4251_v46  ;;  %v2325_v47 = vpack.c.bf16 %v2309_v41, %v2307_v34 }
 0x4a6   :  { %p3320_p10 = por %p3319_p9, %p3318_p8 }
 0x4a7   :  { %v2326_v44 = vpack.c.bf16 %v2310_v50, %v2308_v48 }
 0x4a8   :  { %p3321_p11 = pnand %p3320_p10, %p3314_p7 }
 0x4a9   :  { %2550 = vmatprep.mubr.bf16.mxu1 %v2326_v44 }
 0x4aa   :  { %2551 = vmatmul.mubr.bf16.gmra.mxu1 %v2325_v47 }
 0x532   :  { %v2860_v0 = vpop.f32.mrf.mxu1 }
 0x534   :  { %v2861_v60 = vpop.f32.mrf.mxu1 }
 0x535   :  { %v2862_v28 = vadd.f32 %v2861_v60, %v2860_v0 }
 0x536   :  { %v2863_v12 = vpop.f32.mrf.mxu1 }
 0x537   :  { %v2497_v4 = vadd.f32 %v2862_v28, %v4157_v52 }
 0x538   :  { %v2864_v2 = vpop.f32.mrf.mxu1 }
 0x539   :  { %v2828_v19 = vclamps-f32 %v2497_v4, 1.570795  ;;  %v2865_v35 = vadd.f32 %v2864_v2, %v2863_v12 }
 0x53a   :  { %v2866_v40 = vpop.f32.mrf.mxu1 }
 0x53b   :  { %2591 = vst [vmem:[#allocation14] sm:$0xff] %v2828_v19  ;;  %v2500_v61 = vadd.f32 %v2865_v35, %v4157_v52 }
 0x53c   :  { %v2867_v27 = vpop.f32.mrf.mxu1 }
 0x53d   :  { %v2829_v54 = vclamps-f32 %v2500_v61, 1.570795  ;;  %v2868_v32 = vadd.f32 %v2867_v27, %v2866_v40 }
 0x53e   :  { %v2869_v49 = vpop.f32.mrf.mxu1 }
 0x53f   :  { %2592 = vst [vmem:[#allocation14 + $0x8] sm:$0xff] %v2829_v54  ;;  %v2505_v6 = vadd.f32 %v2868_v32, %v4157_v52 }
 0x540   :  { %v2870_v51 = vpop.f32.mrf.mxu1 }
 0x541   :  { %v2830_v30 = vclamps-f32 %v2505_v6, 1.570795  ;;  %v2871_v59 = vadd.f32 %v2870_v51, %v2869_v49 }
 0x542   :  { %v2872_v58 = vpop.f32.mrf.mxu1 }
 0x543   :  { %2593 = vst [vmem:[#allocation14 + $0x10] sm:$0xff] %v2830_v30  ;;  %v2508_v24 = vadd.f32 %v2871_v59, %v4157_v52 }
 0x544   :  { %v2873_v9 = vpop.f32.mrf.mxu1 }
 0x545   :  { %v2831_v18 = vclamps-f32 %v2508_v24, 1.570795  ;;  %v2874_v7 = vadd.f32 %v2873_v9, %v2872_v58 }
 0x546   :  { %v2875_v39 = vpop.f32.mrf.mxu1 }
 0x547   :  { %2594 = vst [vmem:[#allocation14 + $0x18] sm:$0xff] %v2831_v18  ;;  %v2513_v23 = vadd.f32 %v2874_v7, %v4157_v52 }
 0x548   :  { %v2876_v43 = vpop.f32.mrf.mxu1 }
 0x549   :  { %v2832_v25 = vclamps-f32 %v2513_v23, 1.570795  ;;  %v2877_v10 = vadd.f32 %v2876_v43, %v2875_v39 }
 0x54a   :  { %v2878_v3 = vpop.f32.mrf.mxu1 }
 0x54b   :  { %2595 = vst [vmem:[#allocation14 + $0x20] sm:$0xff] %v2832_v25  ;;  %v2516_v45 = vadd.f32 %v2877_v10, %v4157_v52 }
 0x54c   :  { %v2879_v26 = vpop.f32.mrf.mxu1 }
 0x54d   :  { %v2833_v56 = vclamps-f32 %v2516_v45, 1.570795  ;;  %v2880_v63 = vadd.f32 %v2879_v26, %v2878_v3 }
 0x54e   :  { %v2881_v13 = vpop.f32.mrf.mxu1 }
 0x54f   :  { %2596 = vst [vmem:[#allocation14 + $0x28] sm:$0xff] %v2833_v56  ;;  %v2521_v42 = vadd.f32 %v2880_v63, %v4157_v52 }
 0x550   :  { %v2882_v17 = vpop.f32.mrf.mxu1 }
 0x551   :  { %v2834_v55 = vclamps-f32 %v2521_v42, 1.570795  ;;  %v2883_v1 = vadd.f32 %v2882_v17, %v2881_v13 }
 0x552   :  { %v2884_v62 = vpop.f32.mrf.mxu1 }
 0x553   :  { %2597 = vst [vmem:[#allocation14 + $0x30] sm:$0xff] %v2834_v55  ;;  %v2524_v16 = vadd.f32 %v2883_v1, %v4157_v52 }
 0x554   :  { %v2885_v53 = vpop.f32.mrf.mxu1 }
 0x555   :  { %v2835_v29 = vclamps-f32 %v2524_v16, 1.570795  ;;  %v2886_v8 = vadd.f32 %v2885_v53, %v2884_v62 }
 0x556   :  { %v2887_v57 = vpop.f32.mrf.mxu1 }
 0x557   :  { %2598 = vst [vmem:[#allocation14 + $0x38] sm:$0xff] %v2835_v29  ;;  %v2529_v14 = vadd.f32 %v2886_v8, %v4157_v52 }
 0x558   :  { %v2888_v15 = vpop.f32.mrf.mxu1 }
 0x559   :  { %v2836_v33 = vclamps-f32 %v2529_v14, 1.570795  ;;  %v2889_v20 = vadd.f32 %v2888_v15, %v2887_v57 }
 0x55a   :  { %v2890_v22 = vpop.f32.mrf.mxu1 }
 0x55b   :  { %2599 = vst [vmem:[#allocation14 + $0x40] sm:$0xff] %v2836_v33  ;;  %v2532_v5 = vadd.f32 %v2889_v20, %v4157_v52 }
 0x55c   :  { %v2891_v11 = vpop.f32.mrf.mxu1 }
 0x55d   :  { %v2837_v36 = vclamps-f32 %v2532_v5, 1.570795  ;;  %v2892_v21 = vadd.f32 %v2891_v11, %v2890_v22 }
 0x55e   :  { %v2893_v31 = vpop.f32.mrf.mxu1 }
 0x55f   :  { %2600 = vst [vmem:[#allocation14 + $0x48] sm:$0xff] %v2837_v36  ;;  %v2537_v41 = vadd.f32 %v2892_v21, %v4157_v52 }
 0x560   :  { %v2894_v37 = vpop.f32.mrf.mxu1 }
 0x561   :  { %v2838_v48 = vclamps-f32 %v2537_v41, 1.570795  ;;  %v2895_v46 = vadd.f32 %v2894_v37, %v2893_v31 }
 0x562   :  { %v2896_v50 = vpop.f32.mrf.mxu1 }
 0x563   :  { %2601 = vst [vmem:[#allocation14 + $0x50] sm:$0xff] %v2838_v48  ;;  %v2540_v38 = vadd.f32 %v2895_v46, %v4157_v52 }
 0x564   :  { %v2897_v34 = vpop.f32.mrf.mxu1 }
 0x565   :  { %v2839_v44 = vclamps-f32 %v2540_v38, 1.570795  ;;  %v2898_v47 = vadd.f32 %v2897_v34, %v2896_v50 }
 0x566   :  { %v2899_v0 = vpop.f32.mrf.mxu1 }
 0x567   :  { %2602 = vst [vmem:[#allocation14 + $0x58] sm:$0xff] %v2839_v44  ;;  %v2545_v60 = vadd.f32 %v2898_v47, %v4157_v52 }
 0x568   :  { %v2900_v28 = vpop.f32.mrf.mxu1 }
 0x569   :  { %v2840_v12 = vclamps-f32 %v2545_v60, 1.570795  ;;  %v2901_v4 = vadd.f32 %v2900_v28, %v2899_v0 }
 0x56a   :  { %v2902_v2 = vpop.f32.mrf.mxu1 }
 0x56b   :  { %2603 = vst [vmem:[#allocation14 + $0x60] sm:$0xff] %v2840_v12  ;;  %v2548_v19 = vadd.f32 %v2901_v4, %v4157_v52 }
 0x56c   :  { %v2903_v35 = vpop.f32.mrf.mxu1 }
 0x56d   :  { %v2841_v40 = vclamps-f32 %v2548_v19, 1.570795  ;;  %v2904_v61 = vadd.f32 %v2903_v35, %v2902_v2 }
 0x56e   :  { %v2905_v27 = vpop.f32.mrf.mxu1 }
 0x56f   :  { %2604 = vst [vmem:[#allocation14 + $0x68] sm:$0xff] %v2841_v40  ;;  %v2553_v54 = vadd.f32 %v2904_v61, %v4157_v52 }
 0x570   :  { %v2906_v32 = vpop.f32.mrf.mxu1 }
 0x571   :  { %v2842_v49 = vclamps-f32 %v2553_v54, 1.570795  ;;  %v2907_v6 = vadd.f32 %v2906_v32, %v2905_v27 }
 0x573   :  { %2605 = vst [vmem:[#allocation14 + $0x70] sm:$0xff] %v2842_v49  ;;  %v2556_v51 = vadd.f32 %v2907_v6, %v4157_v52 }
 0x575   :  { %v2843_v30 = vclamps-f32 %v2556_v51, 1.570795 }
 0x577   :  { %2606 = vst [vmem:[#allocation14 + $0x78] sm:$0xff] %v2843_v30 }
 0x578   :  { %3324 = shalt.err (!%p3321_p11)
}
 0x579   :  { %2618 = dma.vmem_to_hbm [thread:$0]  %s2613_s20, 2048, %s4196_s15, [#allocation4], %s3345_s23, %s3345_s23, %s3346_s24  }
 0x57a   :  { %3341 = dma.done.wait [#allocation4], 2048  }
 0x57b   :  { %3342 = vsyncadd [#allocation4], 4294965248 }
 0x57c   :  { %2622 = vsyncpa [#allocation3], 1 }
 0x57d   :  { %2623 = vsyncpa [#allocation6], 1 }
 0x57e   :  { %2624 = vsyncpa [#allocation9], 1 }
 0x57f   :  { %2625 = vsyncpa [#allocation12], 1 }
 0x580   :  { %2626 = vsyncpa [#allocation4], 1 }

</bundles_post_ra>
